<compile_context>
chip_gen: v5e
topology: v5e:2x2
jax: 0.10.0
libtpu: 0.0.40
codegen_flags: <defaults>
</compile_context>

<pallas_src>
import jax
import jax.numpy as jnp
from jax.experimental import pallas as pl
from jax.experimental.pallas import tpu as pltpu

H = 128      # hidden size (fixed by the module)
TAIL = 7     # number of trailing time steps fed to the output Linear


def lstm_kernel(x_ref, wih_ref, bias_ref, whh_ref, wout_ref, bout_ref, out_ref):
    """x_ref:    (T, B, 1)  f32   raw input, time-major
       wih_ref:  (1, 4H)    f32   W_ih[:, 0] as a row
       bias_ref: (1, 4H)    f32   b_ih + b_hh
       whh_ref:  (H, 4H)    bf16  W_hh^T (recurrent weights)
       wout_ref: (1, H)     f32   output Linear weight row
       bout_ref: (1, 1)     f32   output Linear bias
       out_ref:  (TAIL, B, 1) f32 head output for the last TAIL steps."""
    T = x_ref.shape[0]
    B = x_ref.shape[1]

    # Loop-invariant operands, loaded once (bf16 W_hh^T = 32 vregs).
    whh = whh_ref[...]          # (H, 4H) bf16 — stays resident across all steps
    wih = wih_ref[...]          # (1, 4H) f32
    bias = bias_ref[...]        # (1, 4H) f32
    wout = wout_ref[...]        # (1, H)  f32
    bout = bout_ref[...]        # (1, 1)  f32

    def step(h, c, x_t):
        # Input projection: independent of h, pure VPU broadcast-mul-add.
        xg = x_t * wih + bias                                        # (B, 4H)
        # Recurrent matmul on the MXU: bf16 x bf16, f32 accumulation.
        gates = xg + jnp.dot(h.astype(jnp.bfloat16), whh,
                             preferred_element_type=jnp.float32)     # (B, 4H)

        # PyTorch gate order: i, f, g, o (128-lane aligned slices).
        pre_i = gates[:, 0 * H:1 * H]
        pre_f = gates[:, 1 * H:2 * H]
        pre_g = gates[:, 2 * H:3 * H]
        pre_o = gates[:, 3 * H:4 * H]

        # sigmoid(x) = 0.5*tanh(0.5*x) + 0.5  -> exactly one EUP op per gate.
        i_g = 0.5 * jnp.tanh(0.5 * pre_i) + 0.5
        f_g = 0.5 * jnp.tanh(0.5 * pre_f) + 0.5
        o_g = 0.5 * jnp.tanh(0.5 * pre_o) + 0.5
        g_g = jnp.tanh(pre_g)

        c_new = f_g * c + i_g * g_g
        h_new = o_g * jnp.tanh(c_new)
        return h_new, c_new

    h0 = jnp.zeros((B, H), jnp.float32)
    c0 = jnp.zeros((B, H), jnp.float32)

    # First T-TAIL steps: fori_loop bounds live ranges (no stores needed).
    def body(t, carry):
        h, c = carry
        return step(h, c, x_ref[t])

    h, c = jax.lax.fori_loop(0, T - TAIL, body, (h0, c0))

    # Last TAIL steps statically unrolled: fused Linear(128 -> 1) head
    # (VPU multiply + lane reduction) and tiny lane-padded store.
    for k in range(TAIL):
        h, c = step(h, c, x_ref[T - TAIL + k])
        y = jnp.sum(h * wout, axis=-1, keepdims=True) + bout          # (B, 1)
        out_ref[k] = y


def lstm_forward(x, w_ih, w_hh, b_ih, b_hh, w_out, b_out):
    """x: (B, T, 1) float32. Returns (B, TAIL, 1) float32."""
    B, T, _ = x.shape
    assert T >= TAIL

    x_tb = jnp.transpose(x, (1, 0, 2)).astype(jnp.float32)            # (T, B, 1)
    wih_row = jnp.reshape(w_ih, (1, 4 * H)).astype(jnp.float32)       # (1, 4H)
    bias = jnp.reshape(b_ih + b_hh, (1, 4 * H)).astype(jnp.float32)   # (1, 4H)
    whh_t = jnp.transpose(w_hh).astype(jnp.bfloat16)                  # (H, 4H)
    wout_row = jnp.reshape(w_out, (1, H)).astype(jnp.float32)         # (1, H)
    bout = jnp.reshape(b_out, (1, 1)).astype(jnp.float32)             # (1, 1)

    # Advisory cost hint: recurrent matmuls + gate math + 5 transcendentals/step.
    flops = 2 * T * B * H * (4 * H) + 12 * T * B * (4 * H)
    transcendentals = 5 * T * B * H
    bytes_accessed = (x_tb.size * 4 + wih_row.size * 4 + bias.size * 4
                      + whh_t.size * 2 + wout_row.size * 4 + bout.size * 4
                      + TAIL * B * 4)

    vmem = pltpu.MemorySpace.VMEM
    hs = pl.pallas_call(
        lstm_kernel,
        out_shape=jax.ShapeDtypeStruct((TAIL, B, 1), jnp.float32),
        in_specs=[
            pl.BlockSpec(memory_space=vmem),   # x_tb
            pl.BlockSpec(memory_space=vmem),   # W_ih row
            pl.BlockSpec(memory_space=vmem),   # b_ih + b_hh
            pl.BlockSpec(memory_space=vmem),   # W_hh^T (bf16)
            pl.BlockSpec(memory_space=vmem),   # w_out row
            pl.BlockSpec(memory_space=vmem),   # b_out
        ],
        out_specs=pl.BlockSpec(memory_space=vmem),
        cost_estimate=pl.CostEstimate(flops=flops,
                                      transcendentals=transcendentals,
                                      bytes_accessed=bytes_accessed),
    )(x_tb, wih_row, bias, whh_t, wout_row, bout)                     # (TAIL, B, 1)

    return jnp.transpose(hs, (1, 0, 2))                               # (B, TAIL, 1)


def ref_forward(x, w_ih, w_hh, b_ih, b_hh, w_out, b_out):
    """Pure-JAX f32 reference mirroring torch.nn.LSTM + Linear."""
    B, T, _ = x.shape

    def step(carry, x_t):
        h, c = carry
        gates = x_t @ w_ih.T + b_ih + h @ w_hh.T + b_hh
        i = jax.nn.sigmoid(gates[:, 0 * H:1 * H])
        f = jax.nn.sigmoid(gates[:, 1 * H:2 * H])
        g = jnp.tanh(gates[:, 2 * H:3 * H])
        o = jax.nn.sigmoid(gates[:, 3 * H:4 * H])
        c = f * c + i * g
        h = o * jnp.tanh(c)
        return (h, c), h

    h0 = jnp.zeros((B, H), jnp.float32)
    c0 = jnp.zeros((B, H), jnp.float32)
    _, hs = jax.lax.scan(step, (h0, c0), jnp.transpose(x, (1, 0, 2)))
    r_out = jnp.transpose(hs, (1, 0, 2))                  # (B, T, H)
    tail = r_out[:, -TAIL:, :]                            # (B, TAIL, H)
    return tail @ w_out.T + b_out                         # (B, TAIL, 1)


if __name__ == "__main__":
    B, T = 8, 30   # "stock_30_7": sequence of 30 days, predict last 7

    key = jax.random.PRNGKey(0)
    k = jax.random.split(key, 7)
    s = 1.0 / jnp.sqrt(H)   # PyTorch default init: uniform(-1/sqrt(H), 1/sqrt(H))

    x = jax.random.normal(k[0], (B, T, 1), dtype=jnp.float32)
    w_ih = jax.random.uniform(k[1], (4 * H, 1), jnp.float32, -s, s)
    w_hh = jax.random.uniform(k[2], (4 * H, H), jnp.float32, -s, s)
    b_ih = jax.random.uniform(k[3], (4 * H,), jnp.float32, -s, s)
    b_hh = jax.random.uniform(k[4], (4 * H,), jnp.float32, -s, s)
    w_out = jax.random.uniform(k[5], (1, H), jnp.float32, -s, s)
    b_out = jax.random.uniform(k[6], (1,), jnp.float32, -s, s)

    out = lstm_forward(x, w_ih, w_hh, b_ih, b_hh, w_out, b_out)
    out = jax.block_until_ready(out)

    ref = ref_forward(x, w_ih, w_hh, b_ih, b_hh, w_out, b_out)
    assert out.shape == (B, TAIL, 1), out.shape
    # bf16 recurrent-weight matmul (f32 accumulation / f32 gate math) vs the
    # full-f32 reference: observed error is O(1e-3) after 30 steps, so a 2e-2
    # tolerance leaves ample margin while keeping the module's semantics.
    assert jnp.allclose(out, ref, rtol=2e-2, atol=2e-2), (
        float(jnp.max(jnp.abs(out - ref))))

    print("KERNEL_OK")
</pallas_src>

<mosaic_0001>
module attributes {stable_mosaic.version = 11 : i64} {
  func.func @lstm_kernel(%arg0: memref<30x8x1xf32, #tpu.memory_space<vmem>>, %arg1: memref<1x512xf32, #tpu.memory_space<vmem>>, %arg2: memref<1x512xf32, #tpu.memory_space<vmem>>, %arg3: memref<128x512xbf16, #tpu.memory_space<vmem>>, %arg4: memref<1x128xf32, #tpu.memory_space<vmem>>, %arg5: memref<1x1xf32, #tpu.memory_space<vmem>>, %arg6: memref<7x8x1xf32, #tpu.memory_space<vmem>>) attributes {dimension_semantics = [], scalar_prefetch = 0 : i64, scratch_operands = 0 : i64, tpu.core_type = #tpu.core_type<tc>} {
    %c0 = arith.constant 0 : index
    %c0_0 = arith.constant 0 : index
    %0 = vector.load %arg3[%c0, %c0_0] : memref<128x512xbf16, #tpu.memory_space<vmem>>, vector<128x512xbf16>
    %c0_1 = arith.constant 0 : index
    %c0_2 = arith.constant 0 : index
    %1 = vector.load %arg1[%c0_1, %c0_2] : memref<1x512xf32, #tpu.memory_space<vmem>>, vector<1x512xf32>
    %c0_3 = arith.constant 0 : index
    %c0_4 = arith.constant 0 : index
    %2 = vector.load %arg2[%c0_3, %c0_4] : memref<1x512xf32, #tpu.memory_space<vmem>>, vector<1x512xf32>
    %c0_5 = arith.constant 0 : index
    %c0_6 = arith.constant 0 : index
    %3 = vector.load %arg4[%c0_5, %c0_6] : memref<1x128xf32, #tpu.memory_space<vmem>>, vector<1x128xf32>
    %c0_7 = arith.constant 0 : index
    %c0_8 = arith.constant 0 : index
    %4 = vector.load %arg5[%c0_7, %c0_8] : memref<1x1xf32, #tpu.memory_space<vmem>>, vector<1x1xf32>
    %cst = arith.constant 0.000000e+00 : f32
    %5 = vector.broadcast %cst : f32 to vector<8x128xf32>
    %cst_9 = arith.constant 0.000000e+00 : f32
    %6 = vector.broadcast %cst_9 : f32 to vector<8x128xf32>
    %c0_i32 = arith.constant 0 : i32
    %c23_i32 = arith.constant 23 : i32
    %7 = arith.addi %c0_i32, %c23_i32 : i32
    %c1_i32 = arith.constant 1 : i32
    %8:2 = scf.for %arg7 = %c0_i32 to %7 step %c1_i32 iter_args(%arg8 = %5, %arg9 = %6) -> (vector<8x128xf32>, vector<8x128xf32>)  : i32 {
      %359 = arith.index_cast %arg7 : i32 to index
      %c0_117 = arith.constant 0 : index
      %c0_118 = arith.constant 0 : index
      %360 = vector.load %arg0[%359, %c0_117, %c0_118] : memref<30x8x1xf32, #tpu.memory_space<vmem>>, vector<1x8x1xf32>
      %361 = vector.shape_cast %360 : vector<1x8x1xf32> to vector<8x1xf32>
      %362 = vector.broadcast %361 : vector<8x1xf32> to vector<8x512xf32>
      %363 = vector.broadcast %1 : vector<1x512xf32> to vector<8x512xf32>
      %364 = arith.mulf %362, %363 : vector<8x512xf32>
      %365 = vector.broadcast %2 : vector<1x512xf32> to vector<8x512xf32>
      %366 = arith.addf %364, %365 : vector<8x512xf32>
      %367 = arith.truncf %arg8 : vector<8x128xf32> to vector<8x128xbf16>
      %cst_119 = arith.constant dense<0.000000e+00> : vector<8x512xf32>
      %368 = tpu.matmul %367, %0, %cst_119 {dimension_numbers = #tpu.dot_dimension_numbers<[1], [0], [0], [1], [0, 0, 1, 1], [], []>} : vector<8x128xbf16>, vector<128x512xbf16>, vector<8x512xf32> -> vector<8x512xf32>
      %369 = arith.addf %366, %368 : vector<8x512xf32>
      %370 = vector.extract_strided_slice %369 {offsets = [0, 0], sizes = [8, 128], strides = [1, 1]} : vector<8x512xf32> to vector<8x128xf32>
      %371 = vector.extract_strided_slice %369 {offsets = [0, 128], sizes = [8, 128], strides = [1, 1]} : vector<8x512xf32> to vector<8x128xf32>
      %372 = vector.extract_strided_slice %369 {offsets = [0, 256], sizes = [8, 128], strides = [1, 1]} : vector<8x512xf32> to vector<8x128xf32>
      %373 = vector.extract_strided_slice %369 {offsets = [0, 384], sizes = [8, 128], strides = [1, 1]} : vector<8x512xf32> to vector<8x128xf32>
      %cst_120 = arith.constant 5.000000e-01 : f32
      %374 = vector.broadcast %cst_120 : f32 to vector<8x128xf32>
      %375 = arith.mulf %374, %370 : vector<8x128xf32>
      %376 = math.tanh %375 : vector<8x128xf32>
      %cst_121 = arith.constant 5.000000e-01 : f32
      %377 = vector.broadcast %cst_121 : f32 to vector<8x128xf32>
      %378 = arith.mulf %377, %376 : vector<8x128xf32>
      %cst_122 = arith.constant 5.000000e-01 : f32
      %379 = vector.broadcast %cst_122 : f32 to vector<8x128xf32>
      %380 = arith.addf %378, %379 : vector<8x128xf32>
      %cst_123 = arith.constant 5.000000e-01 : f32
      %381 = vector.broadcast %cst_123 : f32 to vector<8x128xf32>
      %382 = arith.mulf %381, %371 : vector<8x128xf32>
      %383 = math.tanh %382 : vector<8x128xf32>
      %cst_124 = arith.constant 5.000000e-01 : f32
      %384 = vector.broadcast %cst_124 : f32 to vector<8x128xf32>
      %385 = arith.mulf %384, %383 : vector<8x128xf32>
      %cst_125 = arith.constant 5.000000e-01 : f32
      %386 = vector.broadcast %cst_125 : f32 to vector<8x128xf32>
      %387 = arith.addf %385, %386 : vector<8x128xf32>
      %cst_126 = arith.constant 5.000000e-01 : f32
      %388 = vector.broadcast %cst_126 : f32 to vector<8x128xf32>
      %389 = arith.mulf %388, %373 : vector<8x128xf32>
      %390 = math.tanh %389 : vector<8x128xf32>
      %cst_127 = arith.constant 5.000000e-01 : f32
      %391 = vector.broadcast %cst_127 : f32 to vector<8x128xf32>
      %392 = arith.mulf %391, %390 : vector<8x128xf32>
      %cst_128 = arith.constant 5.000000e-01 : f32
      %393 = vector.broadcast %cst_128 : f32 to vector<8x128xf32>
      %394 = arith.addf %392, %393 : vector<8x128xf32>
      %395 = math.tanh %372 : vector<8x128xf32>
      %396 = arith.mulf %387, %arg9 : vector<8x128xf32>
      %397 = arith.mulf %380, %395 : vector<8x128xf32>
      %398 = arith.addf %396, %397 : vector<8x128xf32>
      %399 = math.tanh %398 : vector<8x128xf32>
      %400 = arith.mulf %394, %399 : vector<8x128xf32>
      scf.yield %400, %398 : vector<8x128xf32>, vector<8x128xf32>
    }
    %c23_i32_10 = arith.constant 23 : i32
    %c23 = arith.constant 23 : index
    %c0_11 = arith.constant 0 : index
    %c0_12 = arith.constant 0 : index
    %9 = vector.load %arg0[%c23, %c0_11, %c0_12] : memref<30x8x1xf32, #tpu.memory_space<vmem>>, vector<1x8x1xf32>
    %10 = vector.shape_cast %9 : vector<1x8x1xf32> to vector<8x1xf32>
    %11 = vector.broadcast %10 : vector<8x1xf32> to vector<8x512xf32>
    %12 = vector.broadcast %1 : vector<1x512xf32> to vector<8x512xf32>
    %13 = arith.mulf %11, %12 : vector<8x512xf32>
    %14 = vector.broadcast %2 : vector<1x512xf32> to vector<8x512xf32>
    %15 = arith.addf %13, %14 : vector<8x512xf32>
    %16 = arith.truncf %8#0 : vector<8x128xf32> to vector<8x128xbf16>
    %cst_13 = arith.constant dense<0.000000e+00> : vector<8x512xf32>
    %17 = tpu.matmul %16, %0, %cst_13 {dimension_numbers = #tpu.dot_dimension_numbers<[1], [0], [0], [1], [0, 0, 1, 1], [], []>} : vector<8x128xbf16>, vector<128x512xbf16>, vector<8x512xf32> -> vector<8x512xf32>
    %18 = arith.addf %15, %17 : vector<8x512xf32>
    %19 = vector.extract_strided_slice %18 {offsets = [0, 0], sizes = [8, 128], strides = [1, 1]} : vector<8x512xf32> to vector<8x128xf32>
    %20 = vector.extract_strided_slice %18 {offsets = [0, 128], sizes = [8, 128], strides = [1, 1]} : vector<8x512xf32> to vector<8x128xf32>
    %21 = vector.extract_strided_slice %18 {offsets = [0, 256], sizes = [8, 128], strides = [1, 1]} : vector<8x512xf32> to vector<8x128xf32>
    %22 = vector.extract_strided_slice %18 {offsets = [0, 384], sizes = [8, 128], strides = [1, 1]} : vector<8x512xf32> to vector<8x128xf32>
    %cst_14 = arith.constant 5.000000e-01 : f32
    %23 = vector.broadcast %cst_14 : f32 to vector<8x128xf32>
    %24 = arith.mulf %23, %19 : vector<8x128xf32>
    %25 = math.tanh %24 : vector<8x128xf32>
    %cst_15 = arith.constant 5.000000e-01 : f32
    %26 = vector.broadcast %cst_15 : f32 to vector<8x128xf32>
    %27 = arith.mulf %26, %25 : vector<8x128xf32>
    %cst_16 = arith.constant 5.000000e-01 : f32
    %28 = vector.broadcast %cst_16 : f32 to vector<8x128xf32>
    %29 = arith.addf %27, %28 : vector<8x128xf32>
    %cst_17 = arith.constant 5.000000e-01 : f32
    %30 = vector.broadcast %cst_17 : f32 to vector<8x128xf32>
    %31 = arith.mulf %30, %20 : vector<8x128xf32>
    %32 = math.tanh %31 : vector<8x128xf32>
    %cst_18 = arith.constant 5.000000e-01 : f32
    %33 = vector.broadcast %cst_18 : f32 to vector<8x128xf32>
    %34 = arith.mulf %33, %32 : vector<8x128xf32>
    %cst_19 = arith.constant 5.000000e-01 : f32
    %35 = vector.broadcast %cst_19 : f32 to vector<8x128xf32>
    %36 = arith.addf %34, %35 : vector<8x128xf32>
    %cst_20 = arith.constant 5.000000e-01 : f32
    %37 = vector.broadcast %cst_20 : f32 to vector<8x128xf32>
    %38 = arith.mulf %37, %22 : vector<8x128xf32>
    %39 = math.tanh %38 : vector<8x128xf32>
    %cst_21 = arith.constant 5.000000e-01 : f32
    %40 = vector.broadcast %cst_21 : f32 to vector<8x128xf32>
    %41 = arith.mulf %40, %39 : vector<8x128xf32>
    %cst_22 = arith.constant 5.000000e-01 : f32
    %42 = vector.broadcast %cst_22 : f32 to vector<8x128xf32>
    %43 = arith.addf %41, %42 : vector<8x128xf32>
    %44 = math.tanh %21 : vector<8x128xf32>
    %45 = arith.mulf %36, %8#1 : vector<8x128xf32>
    %46 = arith.mulf %29, %44 : vector<8x128xf32>
    %47 = arith.addf %45, %46 : vector<8x128xf32>
    %48 = math.tanh %47 : vector<8x128xf32>
    %49 = arith.mulf %43, %48 : vector<8x128xf32>
    %50 = vector.broadcast %3 : vector<1x128xf32> to vector<8x128xf32>
    %51 = arith.mulf %49, %50 : vector<8x128xf32>
    %cst_23 = arith.constant dense<0.000000e+00> : vector<8xf32>
    %52 = vector.multi_reduction <add>, %51, %cst_23 [1] : vector<8x128xf32> to vector<8xf32>
    %53 = vector.shape_cast %52 : vector<8xf32> to vector<8x1xf32>
    %54 = vector.broadcast %4 : vector<1x1xf32> to vector<8x1xf32>
    %55 = arith.addf %53, %54 : vector<8x1xf32>
    %c0_24 = arith.constant 0 : index
    %c0_25 = arith.constant 0 : index
    %c0_26 = arith.constant 0 : index
    %56 = vector.load %arg6[%c0_24, %c0_25, %c0_26] : memref<7x8x1xf32, #tpu.memory_space<vmem>>, vector<1x8x1xf32>
    %57 = vector.shape_cast %56 : vector<1x8x1xf32> to vector<8x1xf32>
    %58 = vector.shape_cast %55 : vector<8x1xf32> to vector<1x8x1xf32>
    tpu.vector_store %arg6[%c0_24, %c0_25, %c0_26], %58 {strides = array<i32>} : memref<7x8x1xf32, #tpu.memory_space<vmem>>, vector<1x8x1xf32>,
    %c24 = arith.constant 24 : index
    %c0_27 = arith.constant 0 : index
    %c0_28 = arith.constant 0 : index
    %59 = vector.load %arg0[%c24, %c0_27, %c0_28] : memref<30x8x1xf32, #tpu.memory_space<vmem>>, vector<1x8x1xf32>
    %60 = vector.shape_cast %59 : vector<1x8x1xf32> to vector<8x1xf32>
    %61 = vector.broadcast %60 : vector<8x1xf32> to vector<8x512xf32>
    %62 = vector.broadcast %1 : vector<1x512xf32> to vector<8x512xf32>
    %63 = arith.mulf %61, %62 : vector<8x512xf32>
    %64 = vector.broadcast %2 : vector<1x512xf32> to vector<8x512xf32>
    %65 = arith.addf %63, %64 : vector<8x512xf32>
    %66 = arith.truncf %49 : vector<8x128xf32> to vector<8x128xbf16>
    %cst_29 = arith.constant dense<0.000000e+00> : vector<8x512xf32>
    %67 = tpu.matmul %66, %0, %cst_29 {dimension_numbers = #tpu.dot_dimension_numbers<[1], [0], [0], [1], [0, 0, 1, 1], [], []>} : vector<8x128xbf16>, vector<128x512xbf16>, vector<8x512xf32> -> vector<8x512xf32>
    %68 = arith.addf %65, %67 : vector<8x512xf32>
    %69 = vector.extract_strided_slice %68 {offsets = [0, 0], sizes = [8, 128], strides = [1, 1]} : vector<8x512xf32> to vector<8x128xf32>
    %70 = vector.extract_strided_slice %68 {offsets = [0, 128], sizes = [8, 128], strides = [1, 1]} : vector<8x512xf32> to vector<8x128xf32>
    %71 = vector.extract_strided_slice %68 {offsets = [0, 256], sizes = [8, 128], strides = [1, 1]} : vector<8x512xf32> to vector<8x128xf32>
    %72 = vector.extract_strided_slice %68 {offsets = [0, 384], sizes = [8, 128], strides = [1, 1]} : vector<8x512xf32> to vector<8x128xf32>
    %cst_30 = arith.constant 5.000000e-01 : f32
    %73 = vector.broadcast %cst_30 : f32 to vector<8x128xf32>
    %74 = arith.mulf %73, %69 : vector<8x128xf32>
    %75 = math.tanh %74 : vector<8x128xf32>
    %cst_31 = arith.constant 5.000000e-01 : f32
    %76 = vector.broadcast %cst_31 : f32 to vector<8x128xf32>
    %77 = arith.mulf %76, %75 : vector<8x128xf32>
    %cst_32 = arith.constant 5.000000e-01 : f32
    %78 = vector.broadcast %cst_32 : f32 to vector<8x128xf32>
    %79 = arith.addf %77, %78 : vector<8x128xf32>
    %cst_33 = arith.constant 5.000000e-01 : f32
    %80 = vector.broadcast %cst_33 : f32 to vector<8x128xf32>
    %81 = arith.mulf %80, %70 : vector<8x128xf32>
    %82 = math.tanh %81 : vector<8x128xf32>
    %cst_34 = arith.constant 5.000000e-01 : f32
    %83 = vector.broadcast %cst_34 : f32 to vector<8x128xf32>
    %84 = arith.mulf %83, %82 : vector<8x128xf32>
    %cst_35 = arith.constant 5.000000e-01 : f32
    %85 = vector.broadcast %cst_35 : f32 to vector<8x128xf32>
    %86 = arith.addf %84, %85 : vector<8x128xf32>
    %cst_36 = arith.constant 5.000000e-01 : f32
    %87 = vector.broadcast %cst_36 : f32 to vector<8x128xf32>
    %88 = arith.mulf %87, %72 : vector<8x128xf32>
    %89 = math.tanh %88 : vector<8x128xf32>
    %cst_37 = arith.constant 5.000000e-01 : f32
    %90 = vector.broadcast %cst_37 : f32 to vector<8x128xf32>
    %91 = arith.mulf %90, %89 : vector<8x128xf32>
    %cst_38 = arith.constant 5.000000e-01 : f32
    %92 = vector.broadcast %cst_38 : f32 to vector<8x128xf32>
    %93 = arith.addf %91, %92 : vector<8x128xf32>
    %94 = math.tanh %71 : vector<8x128xf32>
    %95 = arith.mulf %86, %47 : vector<8x128xf32>
    %96 = arith.mulf %79, %94 : vector<8x128xf32>
    %97 = arith.addf %95, %96 : vector<8x128xf32>
    %98 = math.tanh %97 : vector<8x128xf32>
    %99 = arith.mulf %93, %98 : vector<8x128xf32>
    %100 = vector.broadcast %3 : vector<1x128xf32> to vector<8x128xf32>
    %101 = arith.mulf %99, %100 : vector<8x128xf32>
    %cst_39 = arith.constant dense<0.000000e+00> : vector<8xf32>
    %102 = vector.multi_reduction <add>, %101, %cst_39 [1] : vector<8x128xf32> to vector<8xf32>
    %103 = vector.shape_cast %102 : vector<8xf32> to vector<8x1xf32>
    %104 = vector.broadcast %4 : vector<1x1xf32> to vector<8x1xf32>
    %105 = arith.addf %103, %104 : vector<8x1xf32>
    %c1 = arith.constant 1 : index
    %c0_40 = arith.constant 0 : index
    %c0_41 = arith.constant 0 : index
    %106 = vector.load %arg6[%c1, %c0_40, %c0_41] : memref<7x8x1xf32, #tpu.memory_space<vmem>>, vector<1x8x1xf32>
    %107 = vector.shape_cast %106 : vector<1x8x1xf32> to vector<8x1xf32>
    %108 = vector.shape_cast %105 : vector<8x1xf32> to vector<1x8x1xf32>
    tpu.vector_store %arg6[%c1, %c0_40, %c0_41], %108 {strides = array<i32>} : memref<7x8x1xf32, #tpu.memory_space<vmem>>, vector<1x8x1xf32>,
    %c25 = arith.constant 25 : index
    %c0_42 = arith.constant 0 : index
    %c0_43 = arith.constant 0 : index
    %109 = vector.load %arg0[%c25, %c0_42, %c0_43] : memref<30x8x1xf32, #tpu.memory_space<vmem>>, vector<1x8x1xf32>
    %110 = vector.shape_cast %109 : vector<1x8x1xf32> to vector<8x1xf32>
    %111 = vector.broadcast %110 : vector<8x1xf32> to vector<8x512xf32>
    %112 = vector.broadcast %1 : vector<1x512xf32> to vector<8x512xf32>
    %113 = arith.mulf %111, %112 : vector<8x512xf32>
    %114 = vector.broadcast %2 : vector<1x512xf32> to vector<8x512xf32>
    %115 = arith.addf %113, %114 : vector<8x512xf32>
    %116 = arith.truncf %99 : vector<8x128xf32> to vector<8x128xbf16>
    %cst_44 = arith.constant dense<0.000000e+00> : vector<8x512xf32>
    %117 = tpu.matmul %116, %0, %cst_44 {dimension_numbers = #tpu.dot_dimension_numbers<[1], [0], [0], [1], [0, 0, 1, 1], [], []>} : vector<8x128xbf16>, vector<128x512xbf16>, vector<8x512xf32> -> vector<8x512xf32>
    %118 = arith.addf %115, %117 : vector<8x512xf32>
    %119 = vector.extract_strided_slice %118 {offsets = [0, 0], sizes = [8, 128], strides = [1, 1]} : vector<8x512xf32> to vector<8x128xf32>
    %120 = vector.extract_strided_slice %118 {offsets = [0, 128], sizes = [8, 128], strides = [1, 1]} : vector<8x512xf32> to vector<8x128xf32>
    %121 = vector.extract_strided_slice %118 {offsets = [0, 256], sizes = [8, 128], strides = [1, 1]} : vector<8x512xf32> to vector<8x128xf32>
    %122 = vector.extract_strided_slice %118 {offsets = [0, 384], sizes = [8, 128], strides = [1, 1]} : vector<8x512xf32> to vector<8x128xf32>
    %cst_45 = arith.constant 5.000000e-01 : f32
    %123 = vector.broadcast %cst_45 : f32 to vector<8x128xf32>
    %124 = arith.mulf %123, %119 : vector<8x128xf32>
    %125 = math.tanh %124 : vector<8x128xf32>
    %cst_46 = arith.constant 5.000000e-01 : f32
    %126 = vector.broadcast %cst_46 : f32 to vector<8x128xf32>
    %127 = arith.mulf %126, %125 : vector<8x128xf32>
    %cst_47 = arith.constant 5.000000e-01 : f32
    %128 = vector.broadcast %cst_47 : f32 to vector<8x128xf32>
    %129 = arith.addf %127, %128 : vector<8x128xf32>
    %cst_48 = arith.constant 5.000000e-01 : f32
    %130 = vector.broadcast %cst_48 : f32 to vector<8x128xf32>
    %131 = arith.mulf %130, %120 : vector<8x128xf32>
    %132 = math.tanh %131 : vector<8x128xf32>
    %cst_49 = arith.constant 5.000000e-01 : f32
    %133 = vector.broadcast %cst_49 : f32 to vector<8x128xf32>
    %134 = arith.mulf %133, %132 : vector<8x128xf32>
    %cst_50 = arith.constant 5.000000e-01 : f32
    %135 = vector.broadcast %cst_50 : f32 to vector<8x128xf32>
    %136 = arith.addf %134, %135 : vector<8x128xf32>
    %cst_51 = arith.constant 5.000000e-01 : f32
    %137 = vector.broadcast %cst_51 : f32 to vector<8x128xf32>
    %138 = arith.mulf %137, %122 : vector<8x128xf32>
    %139 = math.tanh %138 : vector<8x128xf32>
    %cst_52 = arith.constant 5.000000e-01 : f32
    %140 = vector.broadcast %cst_52 : f32 to vector<8x128xf32>
    %141 = arith.mulf %140, %139 : vector<8x128xf32>
    %cst_53 = arith.constant 5.000000e-01 : f32
    %142 = vector.broadcast %cst_53 : f32 to vector<8x128xf32>
    %143 = arith.addf %141, %142 : vector<8x128xf32>
    %144 = math.tanh %121 : vector<8x128xf32>
    %145 = arith.mulf %136, %97 : vector<8x128xf32>
    %146 = arith.mulf %129, %144 : vector<8x128xf32>
    %147 = arith.addf %145, %146 : vector<8x128xf32>
    %148 = math.tanh %147 : vector<8x128xf32>
    %149 = arith.mulf %143, %148 : vector<8x128xf32>
    %150 = vector.broadcast %3 : vector<1x128xf32> to vector<8x128xf32>
    %151 = arith.mulf %149, %150 : vector<8x128xf32>
    %cst_54 = arith.constant dense<0.000000e+00> : vector<8xf32>
    %152 = vector.multi_reduction <add>, %151, %cst_54 [1] : vector<8x128xf32> to vector<8xf32>
    %153 = vector.shape_cast %152 : vector<8xf32> to vector<8x1xf32>
    %154 = vector.broadcast %4 : vector<1x1xf32> to vector<8x1xf32>
    %155 = arith.addf %153, %154 : vector<8x1xf32>
    %c2 = arith.constant 2 : index
    %c0_55 = arith.constant 0 : index
    %c0_56 = arith.constant 0 : index
    %156 = vector.load %arg6[%c2, %c0_55, %c0_56] : memref<7x8x1xf32, #tpu.memory_space<vmem>>, vector<1x8x1xf32>
    %157 = vector.shape_cast %156 : vector<1x8x1xf32> to vector<8x1xf32>
    %158 = vector.shape_cast %155 : vector<8x1xf32> to vector<1x8x1xf32>
    tpu.vector_store %arg6[%c2, %c0_55, %c0_56], %158 {strides = array<i32>} : memref<7x8x1xf32, #tpu.memory_space<vmem>>, vector<1x8x1xf32>,
    %c26 = arith.constant 26 : index
    %c0_57 = arith.constant 0 : index
    %c0_58 = arith.constant 0 : index
    %159 = vector.load %arg0[%c26, %c0_57, %c0_58] : memref<30x8x1xf32, #tpu.memory_space<vmem>>, vector<1x8x1xf32>
    %160 = vector.shape_cast %159 : vector<1x8x1xf32> to vector<8x1xf32>
    %161 = vector.broadcast %160 : vector<8x1xf32> to vector<8x512xf32>
    %162 = vector.broadcast %1 : vector<1x512xf32> to vector<8x512xf32>
    %163 = arith.mulf %161, %162 : vector<8x512xf32>
    %164 = vector.broadcast %2 : vector<1x512xf32> to vector<8x512xf32>
    %165 = arith.addf %163, %164 : vector<8x512xf32>
    %166 = arith.truncf %149 : vector<8x128xf32> to vector<8x128xbf16>
    %cst_59 = arith.constant dense<0.000000e+00> : vector<8x512xf32>
    %167 = tpu.matmul %166, %0, %cst_59 {dimension_numbers = #tpu.dot_dimension_numbers<[1], [0], [0], [1], [0, 0, 1, 1], [], []>} : vector<8x128xbf16>, vector<128x512xbf16>, vector<8x512xf32> -> vector<8x512xf32>
    %168 = arith.addf %165, %167 : vector<8x512xf32>
    %169 = vector.extract_strided_slice %168 {offsets = [0, 0], sizes = [8, 128], strides = [1, 1]} : vector<8x512xf32> to vector<8x128xf32>
    %170 = vector.extract_strided_slice %168 {offsets = [0, 128], sizes = [8, 128], strides = [1, 1]} : vector<8x512xf32> to vector<8x128xf32>
    %171 = vector.extract_strided_slice %168 {offsets = [0, 256], sizes = [8, 128], strides = [1, 1]} : vector<8x512xf32> to vector<8x128xf32>
    %172 = vector.extract_strided_slice %168 {offsets = [0, 384], sizes = [8, 128], strides = [1, 1]} : vector<8x512xf32> to vector<8x128xf32>
    %cst_60 = arith.constant 5.000000e-01 : f32
    %173 = vector.broadcast %cst_60 : f32 to vector<8x128xf32>
    %174 = arith.mulf %173, %169 : vector<8x128xf32>
    %175 = math.tanh %174 : vector<8x128xf32>
    %cst_61 = arith.constant 5.000000e-01 : f32
    %176 = vector.broadcast %cst_61 : f32 to vector<8x128xf32>
    %177 = arith.mulf %176, %175 : vector<8x128xf32>
    %cst_62 = arith.constant 5.000000e-01 : f32
    %178 = vector.broadcast %cst_62 : f32 to vector<8x128xf32>
    %179 = arith.addf %177, %178 : vector<8x128xf32>
    %cst_63 = arith.constant 5.000000e-01 : f32
    %180 = vector.broadcast %cst_63 : f32 to vector<8x128xf32>
    %181 = arith.mulf %180, %170 : vector<8x128xf32>
    %182 = math.tanh %181 : vector<8x128xf32>
    %cst_64 = arith.constant 5.000000e-01 : f32
    %183 = vector.broadcast %cst_64 : f32 to vector<8x128xf32>
    %184 = arith.mulf %183, %182 : vector<8x128xf32>
    %cst_65 = arith.constant 5.000000e-01 : f32
    %185 = vector.broadcast %cst_65 : f32 to vector<8x128xf32>
    %186 = arith.addf %184, %185 : vector<8x128xf32>
    %cst_66 = arith.constant 5.000000e-01 : f32
    %187 = vector.broadcast %cst_66 : f32 to vector<8x128xf32>
    %188 = arith.mulf %187, %172 : vector<8x128xf32>
    %189 = math.tanh %188 : vector<8x128xf32>
    %cst_67 = arith.constant 5.000000e-01 : f32
    %190 = vector.broadcast %cst_67 : f32 to vector<8x128xf32>
    %191 = arith.mulf %190, %189 : vector<8x128xf32>
    %cst_68 = arith.constant 5.000000e-01 : f32
    %192 = vector.broadcast %cst_68 : f32 to vector<8x128xf32>
    %193 = arith.addf %191, %192 : vector<8x128xf32>
    %194 = math.tanh %171 : vector<8x128xf32>
    %195 = arith.mulf %186, %147 : vector<8x128xf32>
    %196 = arith.mulf %179, %194 : vector<8x128xf32>
    %197 = arith.addf %195, %196 : vector<8x128xf32>
    %198 = math.tanh %197 : vector<8x128xf32>
    %199 = arith.mulf %193, %198 : vector<8x128xf32>
    %200 = vector.broadcast %3 : vector<1x128xf32> to vector<8x128xf32>
    %201 = arith.mulf %199, %200 : vector<8x128xf32>
    %cst_69 = arith.constant dense<0.000000e+00> : vector<8xf32>
    %202 = vector.multi_reduction <add>, %201, %cst_69 [1] : vector<8x128xf32> to vector<8xf32>
    %203 = vector.shape_cast %202 : vector<8xf32> to vector<8x1xf32>
    %204 = vector.broadcast %4 : vector<1x1xf32> to vector<8x1xf32>
    %205 = arith.addf %203, %204 : vector<8x1xf32>
    %c3 = arith.constant 3 : index
    %c0_70 = arith.constant 0 : index
    %c0_71 = arith.constant 0 : index
    %206 = vector.load %arg6[%c3, %c0_70, %c0_71] : memref<7x8x1xf32, #tpu.memory_space<vmem>>, vector<1x8x1xf32>
    %207 = vector.shape_cast %206 : vector<1x8x1xf32> to vector<8x1xf32>
    %208 = vector.shape_cast %205 : vector<8x1xf32> to vector<1x8x1xf32>
    tpu.vector_store %arg6[%c3, %c0_70, %c0_71], %208 {strides = array<i32>} : memref<7x8x1xf32, #tpu.memory_space<vmem>>, vector<1x8x1xf32>,
    %c27 = arith.constant 27 : index
    %c0_72 = arith.constant 0 : index
    %c0_73 = arith.constant 0 : index
    %209 = vector.load %arg0[%c27, %c0_72, %c0_73] : memref<30x8x1xf32, #tpu.memory_space<vmem>>, vector<1x8x1xf32>
    %210 = vector.shape_cast %209 : vector<1x8x1xf32> to vector<8x1xf32>
    %211 = vector.broadcast %210 : vector<8x1xf32> to vector<8x512xf32>
    %212 = vector.broadcast %1 : vector<1x512xf32> to vector<8x512xf32>
    %213 = arith.mulf %211, %212 : vector<8x512xf32>
    %214 = vector.broadcast %2 : vector<1x512xf32> to vector<8x512xf32>
    %215 = arith.addf %213, %214 : vector<8x512xf32>
    %216 = arith.truncf %199 : vector<8x128xf32> to vector<8x128xbf16>
    %cst_74 = arith.constant dense<0.000000e+00> : vector<8x512xf32>
    %217 = tpu.matmul %216, %0, %cst_74 {dimension_numbers = #tpu.dot_dimension_numbers<[1], [0], [0], [1], [0, 0, 1, 1], [], []>} : vector<8x128xbf16>, vector<128x512xbf16>, vector<8x512xf32> -> vector<8x512xf32>
    %218 = arith.addf %215, %217 : vector<8x512xf32>
    %219 = vector.extract_strided_slice %218 {offsets = [0, 0], sizes = [8, 128], strides = [1, 1]} : vector<8x512xf32> to vector<8x128xf32>
    %220 = vector.extract_strided_slice %218 {offsets = [0, 128], sizes = [8, 128], strides = [1, 1]} : vector<8x512xf32> to vector<8x128xf32>
    %221 = vector.extract_strided_slice %218 {offsets = [0, 256], sizes = [8, 128], strides = [1, 1]} : vector<8x512xf32> to vector<8x128xf32>
    %222 = vector.extract_strided_slice %218 {offsets = [0, 384], sizes = [8, 128], strides = [1, 1]} : vector<8x512xf32> to vector<8x128xf32>
    %cst_75 = arith.constant 5.000000e-01 : f32
    %223 = vector.broadcast %cst_75 : f32 to vector<8x128xf32>
    %224 = arith.mulf %223, %219 : vector<8x128xf32>
    %225 = math.tanh %224 : vector<8x128xf32>
    %cst_76 = arith.constant 5.000000e-01 : f32
    %226 = vector.broadcast %cst_76 : f32 to vector<8x128xf32>
    %227 = arith.mulf %226, %225 : vector<8x128xf32>
    %cst_77 = arith.constant 5.000000e-01 : f32
    %228 = vector.broadcast %cst_77 : f32 to vector<8x128xf32>
    %229 = arith.addf %227, %228 : vector<8x128xf32>
    %cst_78 = arith.constant 5.000000e-01 : f32
    %230 = vector.broadcast %cst_78 : f32 to vector<8x128xf32>
    %231 = arith.mulf %230, %220 : vector<8x128xf32>
    %232 = math.tanh %231 : vector<8x128xf32>
    %cst_79 = arith.constant 5.000000e-01 : f32
    %233 = vector.broadcast %cst_79 : f32 to vector<8x128xf32>
    %234 = arith.mulf %233, %232 : vector<8x128xf32>
    %cst_80 = arith.constant 5.000000e-01 : f32
    %235 = vector.broadcast %cst_80 : f32 to vector<8x128xf32>
    %236 = arith.addf %234, %235 : vector<8x128xf32>
    %cst_81 = arith.constant 5.000000e-01 : f32
    %237 = vector.broadcast %cst_81 : f32 to vector<8x128xf32>
    %238 = arith.mulf %237, %222 : vector<8x128xf32>
    %239 = math.tanh %238 : vector<8x128xf32>
    %cst_82 = arith.constant 5.000000e-01 : f32
    %240 = vector.broadcast %cst_82 : f32 to vector<8x128xf32>
    %241 = arith.mulf %240, %239 : vector<8x128xf32>
    %cst_83 = arith.constant 5.000000e-01 : f32
    %242 = vector.broadcast %cst_83 : f32 to vector<8x128xf32>
    %243 = arith.addf %241, %242 : vector<8x128xf32>
    %244 = math.tanh %221 : vector<8x128xf32>
    %245 = arith.mulf %236, %197 : vector<8x128xf32>
    %246 = arith.mulf %229, %244 : vector<8x128xf32>
    %247 = arith.addf %245, %246 : vector<8x128xf32>
    %248 = math.tanh %247 : vector<8x128xf32>
    %249 = arith.mulf %243, %248 : vector<8x128xf32>
    %250 = vector.broadcast %3 : vector<1x128xf32> to vector<8x128xf32>
    %251 = arith.mulf %249, %250 : vector<8x128xf32>
    %cst_84 = arith.constant dense<0.000000e+00> : vector<8xf32>
    %252 = vector.multi_reduction <add>, %251, %cst_84 [1] : vector<8x128xf32> to vector<8xf32>
    %253 = vector.shape_cast %252 : vector<8xf32> to vector<8x1xf32>
    %254 = vector.broadcast %4 : vector<1x1xf32> to vector<8x1xf32>
    %255 = arith.addf %253, %254 : vector<8x1xf32>
    %c4 = arith.constant 4 : index
    %c0_85 = arith.constant 0 : index
    %c0_86 = arith.constant 0 : index
    %256 = vector.load %arg6[%c4, %c0_85, %c0_86] : memref<7x8x1xf32, #tpu.memory_space<vmem>>, vector<1x8x1xf32>
    %257 = vector.shape_cast %256 : vector<1x8x1xf32> to vector<8x1xf32>
    %258 = vector.shape_cast %255 : vector<8x1xf32> to vector<1x8x1xf32>
    tpu.vector_store %arg6[%c4, %c0_85, %c0_86], %258 {strides = array<i32>} : memref<7x8x1xf32, #tpu.memory_space<vmem>>, vector<1x8x1xf32>,
    %c28 = arith.constant 28 : index
    %c0_87 = arith.constant 0 : index
    %c0_88 = arith.constant 0 : index
    %259 = vector.load %arg0[%c28, %c0_87, %c0_88] : memref<30x8x1xf32, #tpu.memory_space<vmem>>, vector<1x8x1xf32>
    %260 = vector.shape_cast %259 : vector<1x8x1xf32> to vector<8x1xf32>
    %261 = vector.broadcast %260 : vector<8x1xf32> to vector<8x512xf32>
    %262 = vector.broadcast %1 : vector<1x512xf32> to vector<8x512xf32>
    %263 = arith.mulf %261, %262 : vector<8x512xf32>
    %264 = vector.broadcast %2 : vector<1x512xf32> to vector<8x512xf32>
    %265 = arith.addf %263, %264 : vector<8x512xf32>
    %266 = arith.truncf %249 : vector<8x128xf32> to vector<8x128xbf16>
    %cst_89 = arith.constant dense<0.000000e+00> : vector<8x512xf32>
    %267 = tpu.matmul %266, %0, %cst_89 {dimension_numbers = #tpu.dot_dimension_numbers<[1], [0], [0], [1], [0, 0, 1, 1], [], []>} : vector<8x128xbf16>, vector<128x512xbf16>, vector<8x512xf32> -> vector<8x512xf32>
    %268 = arith.addf %265, %267 : vector<8x512xf32>
    %269 = vector.extract_strided_slice %268 {offsets = [0, 0], sizes = [8, 128], strides = [1, 1]} : vector<8x512xf32> to vector<8x128xf32>
    %270 = vector.extract_strided_slice %268 {offsets = [0, 128], sizes = [8, 128], strides = [1, 1]} : vector<8x512xf32> to vector<8x128xf32>
    %271 = vector.extract_strided_slice %268 {offsets = [0, 256], sizes = [8, 128], strides = [1, 1]} : vector<8x512xf32> to vector<8x128xf32>
    %272 = vector.extract_strided_slice %268 {offsets = [0, 384], sizes = [8, 128], strides = [1, 1]} : vector<8x512xf32> to vector<8x128xf32>
    %cst_90 = arith.constant 5.000000e-01 : f32
    %273 = vector.broadcast %cst_90 : f32 to vector<8x128xf32>
    %274 = arith.mulf %273, %269 : vector<8x128xf32>
    %275 = math.tanh %274 : vector<8x128xf32>
    %cst_91 = arith.constant 5.000000e-01 : f32
    %276 = vector.broadcast %cst_91 : f32 to vector<8x128xf32>
    %277 = arith.mulf %276, %275 : vector<8x128xf32>
    %cst_92 = arith.constant 5.000000e-01 : f32
    %278 = vector.broadcast %cst_92 : f32 to vector<8x128xf32>
    %279 = arith.addf %277, %278 : vector<8x128xf32>
    %cst_93 = arith.constant 5.000000e-01 : f32
    %280 = vector.broadcast %cst_93 : f32 to vector<8x128xf32>
    %281 = arith.mulf %280, %270 : vector<8x128xf32>
    %282 = math.tanh %281 : vector<8x128xf32>
    %cst_94 = arith.constant 5.000000e-01 : f32
    %283 = vector.broadcast %cst_94 : f32 to vector<8x128xf32>
    %284 = arith.mulf %283, %282 : vector<8x128xf32>
    %cst_95 = arith.constant 5.000000e-01 : f32
    %285 = vector.broadcast %cst_95 : f32 to vector<8x128xf32>
    %286 = arith.addf %284, %285 : vector<8x128xf32>
    %cst_96 = arith.constant 5.000000e-01 : f32
    %287 = vector.broadcast %cst_96 : f32 to vector<8x128xf32>
    %288 = arith.mulf %287, %272 : vector<8x128xf32>
    %289 = math.tanh %288 : vector<8x128xf32>
    %cst_97 = arith.constant 5.000000e-01 : f32
    %290 = vector.broadcast %cst_97 : f32 to vector<8x128xf32>
    %291 = arith.mulf %290, %289 : vector<8x128xf32>
    %cst_98 = arith.constant 5.000000e-01 : f32
    %292 = vector.broadcast %cst_98 : f32 to vector<8x128xf32>
    %293 = arith.addf %291, %292 : vector<8x128xf32>
    %294 = math.tanh %271 : vector<8x128xf32>
    %295 = arith.mulf %286, %247 : vector<8x128xf32>
    %296 = arith.mulf %279, %294 : vector<8x128xf32>
    %297 = arith.addf %295, %296 : vector<8x128xf32>
    %298 = math.tanh %297 : vector<8x128xf32>
    %299 = arith.mulf %293, %298 : vector<8x128xf32>
    %300 = vector.broadcast %3 : vector<1x128xf32> to vector<8x128xf32>
    %301 = arith.mulf %299, %300 : vector<8x128xf32>
    %cst_99 = arith.constant dense<0.000000e+00> : vector<8xf32>
    %302 = vector.multi_reduction <add>, %301, %cst_99 [1] : vector<8x128xf32> to vector<8xf32>
    %303 = vector.shape_cast %302 : vector<8xf32> to vector<8x1xf32>
    %304 = vector.broadcast %4 : vector<1x1xf32> to vector<8x1xf32>
    %305 = arith.addf %303, %304 : vector<8x1xf32>
    %c5 = arith.constant 5 : index
    %c0_100 = arith.constant 0 : index
    %c0_101 = arith.constant 0 : index
    %306 = vector.load %arg6[%c5, %c0_100, %c0_101] : memref<7x8x1xf32, #tpu.memory_space<vmem>>, vector<1x8x1xf32>
    %307 = vector.shape_cast %306 : vector<1x8x1xf32> to vector<8x1xf32>
    %308 = vector.shape_cast %305 : vector<8x1xf32> to vector<1x8x1xf32>
    tpu.vector_store %arg6[%c5, %c0_100, %c0_101], %308 {strides = array<i32>} : memref<7x8x1xf32, #tpu.memory_space<vmem>>, vector<1x8x1xf32>,
    %c29 = arith.constant 29 : index
    %c0_102 = arith.constant 0 : index
    %c0_103 = arith.constant 0 : index
    %309 = vector.load %arg0[%c29, %c0_102, %c0_103] : memref<30x8x1xf32, #tpu.memory_space<vmem>>, vector<1x8x1xf32>
    %310 = vector.shape_cast %309 : vector<1x8x1xf32> to vector<8x1xf32>
    %311 = vector.broadcast %310 : vector<8x1xf32> to vector<8x512xf32>
    %312 = vector.broadcast %1 : vector<1x512xf32> to vector<8x512xf32>
    %313 = arith.mulf %311, %312 : vector<8x512xf32>
    %314 = vector.broadcast %2 : vector<1x512xf32> to vector<8x512xf32>
    %315 = arith.addf %313, %314 : vector<8x512xf32>
    %316 = arith.truncf %299 : vector<8x128xf32> to vector<8x128xbf16>
    %cst_104 = arith.constant dense<0.000000e+00> : vector<8x512xf32>
    %317 = tpu.matmul %316, %0, %cst_104 {dimension_numbers = #tpu.dot_dimension_numbers<[1], [0], [0], [1], [0, 0, 1, 1], [], []>} : vector<8x128xbf16>, vector<128x512xbf16>, vector<8x512xf32> -> vector<8x512xf32>
    %318 = arith.addf %315, %317 : vector<8x512xf32>
    %319 = vector.extract_strided_slice %318 {offsets = [0, 0], sizes = [8, 128], strides = [1, 1]} : vector<8x512xf32> to vector<8x128xf32>
    %320 = vector.extract_strided_slice %318 {offsets = [0, 128], sizes = [8, 128], strides = [1, 1]} : vector<8x512xf32> to vector<8x128xf32>
    %321 = vector.extract_strided_slice %318 {offsets = [0, 256], sizes = [8, 128], strides = [1, 1]} : vector<8x512xf32> to vector<8x128xf32>
    %322 = vector.extract_strided_slice %318 {offsets = [0, 384], sizes = [8, 128], strides = [1, 1]} : vector<8x512xf32> to vector<8x128xf32>
    %cst_105 = arith.constant 5.000000e-01 : f32
    %323 = vector.broadcast %cst_105 : f32 to vector<8x128xf32>
    %324 = arith.mulf %323, %319 : vector<8x128xf32>
    %325 = math.tanh %324 : vector<8x128xf32>
    %cst_106 = arith.constant 5.000000e-01 : f32
    %326 = vector.broadcast %cst_106 : f32 to vector<8x128xf32>
    %327 = arith.mulf %326, %325 : vector<8x128xf32>
    %cst_107 = arith.constant 5.000000e-01 : f32
    %328 = vector.broadcast %cst_107 : f32 to vector<8x128xf32>
    %329 = arith.addf %327, %328 : vector<8x128xf32>
    %cst_108 = arith.constant 5.000000e-01 : f32
    %330 = vector.broadcast %cst_108 : f32 to vector<8x128xf32>
    %331 = arith.mulf %330, %320 : vector<8x128xf32>
    %332 = math.tanh %331 : vector<8x128xf32>
    %cst_109 = arith.constant 5.000000e-01 : f32
    %333 = vector.broadcast %cst_109 : f32 to vector<8x128xf32>
    %334 = arith.mulf %333, %332 : vector<8x128xf32>
    %cst_110 = arith.constant 5.000000e-01 : f32
    %335 = vector.broadcast %cst_110 : f32 to vector<8x128xf32>
    %336 = arith.addf %334, %335 : vector<8x128xf32>
    %cst_111 = arith.constant 5.000000e-01 : f32
    %337 = vector.broadcast %cst_111 : f32 to vector<8x128xf32>
    %338 = arith.mulf %337, %322 : vector<8x128xf32>
    %339 = math.tanh %338 : vector<8x128xf32>
    %cst_112 = arith.constant 5.000000e-01 : f32
    %340 = vector.broadcast %cst_112 : f32 to vector<8x128xf32>
    %341 = arith.mulf %340, %339 : vector<8x128xf32>
    %cst_113 = arith.constant 5.000000e-01 : f32
    %342 = vector.broadcast %cst_113 : f32 to vector<8x128xf32>
    %343 = arith.addf %341, %342 : vector<8x128xf32>
    %344 = math.tanh %321 : vector<8x128xf32>
    %345 = arith.mulf %336, %297 : vector<8x128xf32>
    %346 = arith.mulf %329, %344 : vector<8x128xf32>
    %347 = arith.addf %345, %346 : vector<8x128xf32>
    %348 = math.tanh %347 : vector<8x128xf32>
    %349 = arith.mulf %343, %348 : vector<8x128xf32>
    %350 = vector.broadcast %3 : vector<1x128xf32> to vector<8x128xf32>
    %351 = arith.mulf %349, %350 : vector<8x128xf32>
    %cst_114 = arith.constant dense<0.000000e+00> : vector<8xf32>
    %352 = vector.multi_reduction <add>, %351, %cst_114 [1] : vector<8x128xf32> to vector<8xf32>
    %353 = vector.shape_cast %352 : vector<8xf32> to vector<8x1xf32>
    %354 = vector.broadcast %4 : vector<1x1xf32> to vector<8x1xf32>
    %355 = arith.addf %353, %354 : vector<8x1xf32>
    %c6 = arith.constant 6 : index
    %c0_115 = arith.constant 0 : index
    %c0_116 = arith.constant 0 : index
    %356 = vector.load %arg6[%c6, %c0_115, %c0_116] : memref<7x8x1xf32, #tpu.memory_space<vmem>>, vector<1x8x1xf32>
    %357 = vector.shape_cast %356 : vector<1x8x1xf32> to vector<8x1xf32>
    %358 = vector.shape_cast %355 : vector<8x1xf32> to vector<1x8x1xf32>
    tpu.vector_store %arg6[%c6, %c0_115, %c0_116], %358 {strides = array<i32>} : memref<7x8x1xf32, #tpu.memory_space<vmem>>, vector<1x8x1xf32>,
    return
  }
}

</mosaic_0001>

<bundles_post_ra>
// kernel: tpu_custom_call.1
= control target key start
LH: loop header
LB: loop body
LE: loop exit
PB: predicated region body
PF: predicated region fallthrough
CT: control target
= control target key end

     0   :  { %s2690_s0 = inlined_call_operand.vmem [shape: f32[30,8,1], index: 0, kind: input, shape index: {}]   ;;  %s2691_s1 = inlined_call_operand.vmem [shape: f32[1,512], index: 1, kind: input, shape index: {}]   ;;  %s2692_s2 = inlined_call_operand.vmem [shape: f32[1,512], index: 2, kind: input, shape index: {}]   ;;  %s2693_s3 = inlined_call_operand.hbm [shape: bf16[128,512], index: 3, kind: input, shape index: {}]   ;;  %s2694_s4 = inlined_call_operand.vmem [shape: f32[1,128], index: 4, kind: input, shape index: {}]   ;;  %s2695_s5 = inlined_call_operand.<no memory space> [shape: f32[1,1], index: 5, kind: input, shape index: {}]   ;;  %s2696_s6 = inlined_call_operand.vmem [shape: f32[7,8,1], index: 6, kind: output, shape index: {}]  }
   0x1   :  { %v11_v0 = vstv %s2695_s5 }
   0x2   :  { %12 = vst [vmem:[#allocation2] sm:$0x1] %v11_v0 }
   0x3   :  { %13 = vsyncpa [#allocation4], 0  ;;  %s24_s25 = sshll.u32 %s2693_s3, 4  ;;  %s1725_s26 = smov [#allocation3]   ;;  %s25_s25 = int_to_ptr.hbm [resolvable:$true] %s24_s25 }
   0x4   :  { %s26_s27 = sshll.u32 %s1725_s26, 4  ;;  %s1726_s28 = smov 256   ;;  %s27_s27 = int_to_ptr.vmem [resolvable:$true] %s26_s27 }
   0x5   :  { %s1727_s29 = smov 16  }
   0x6   :  { %32 = dma.hbm_to_vmem [thread:$0]  %s25_s25, 4096, %s27_s27, [#allocation4], %s1726_s28, %s1726_s28, %s1727_s29  }
   0x7   :  { %1711 = dma.done.wait [#allocation4], 4096  }
   0x8   :  { %1712 = vsyncadd [#allocation4], 4294963200  ;;  %v1771_v1 = vld [vmem:[#allocation3 + $0x4] sm:$0xf]  ;;  %v1773_v2 = vld [vmem:[#allocation3] sm:$0xf] }
   0x9   :  { %2704 = vst [vmem:[#allocation6_spill] sm:$0xff] %v1771_v1  ;;  %v1775_v3 = vld [vmem:[#allocation3 + $0x4] sm:$0xf]  ;;  %v1777_v4 = vld [vmem:[#allocation3] sm:$0xf]  ;;  %s2048_s10 = smov 0  }
   0xa   :  { %2705 = vst [vmem:[#allocation7_spill] sm:$0xff] %v1773_v2  ;;  %v1779_v5 = vld [vmem:[#allocation3 + $0xc] sm:$0xf]  ;;  %v1781_v6 = vld [vmem:[#allocation3 + $0x8] sm:$0xf] }
   0xb   :  { %2706 = vst [vmem:[#allocation8_spill] sm:$0xff] %v1775_v3  ;;  %v1783_v7 = vld [vmem:[#allocation3 + $0xc] sm:$0xf]  ;;  %v1785_v8 = vld [vmem:[#allocation3 + $0x8] sm:$0xf] }
   0xc   :  { %2707 = vst [vmem:[#allocation9_spill] sm:$0xff] %v1777_v4  ;;  %v1787_v9 = vld [vmem:[#allocation3 + $0x10] sm:$0xf0]  ;;  %v1789_v10 = vld [vmem:[#allocation3 + $0xc] sm:$0xf0] }
   0xd   :  { %2708 = vst [vmem:[#allocation10_spill] sm:$0xff] %v1779_v5  ;;  %v1791_v11 = vld [vmem:[#allocation3 + $0x10] sm:$0xf0]  ;;  %v1793_v12 = vld [vmem:[#allocation3 + $0xc] sm:$0xf0] }
   0xe   :  { %2709 = vst [vmem:[#allocation11_spill] sm:$0xff] %v1781_v6  ;;  %v1795_v13 = vld [vmem:[#allocation3 + $0x18] sm:$0xf0]  ;;  %v1797_v14 = vld [vmem:[#allocation3 + $0x14] sm:$0xf0] }
   0xf   :  { %2710 = vst [vmem:[#allocation12_spill] sm:$0xff] %v1783_v7  ;;  %v1799_v15 = vld [vmem:[#allocation3 + $0x18] sm:$0xf0]  ;;  %v1801_v16 = vld [vmem:[#allocation3 + $0x14] sm:$0xf0] }
  0x10   :  { %2711 = vst [vmem:[#allocation13_spill] sm:$0xff] %v1785_v8  ;;  %v1803_v17 = vld [vmem:[#allocation3 + $0x24] sm:$0xf]  ;;  %v1805_v18 = vld [vmem:[#allocation3 + $0x20] sm:$0xf] }
  0x11   :  { %2712 = vst [vmem:[#allocation14_spill] sm:$0xff] %v1787_v9  ;;  %v1807_v19 = vld [vmem:[#allocation3 + $0x24] sm:$0xf]  ;;  %v1809_v20 = vld [vmem:[#allocation3 + $0x20] sm:$0xf] }
  0x12   :  { %2713 = vst [vmem:[#allocation15_spill] sm:$0xff] %v1789_v10  ;;  %v1811_v21 = vld [vmem:[#allocation3 + $0x2c] sm:$0xf]  ;;  %v1813_v22 = vld [vmem:[#allocation3 + $0x28] sm:$0xf] }
  0x13   :  { %2714 = vst [vmem:[#allocation16_spill] sm:$0xff] %v1791_v11  ;;  %v1815_v23 = vld [vmem:[#allocation3 + $0x2c] sm:$0xf]  ;;  %v1817_v24 = vld [vmem:[#allocation3 + $0x28] sm:$0xf]  ;;  %v2046_v11 = vmov 0.0  }
  0x14   :  { %2715 = vst [vmem:[#allocation17_spill] sm:$0xff] %v1793_v12  ;;  %v1819_v25 = vld [vmem:[#allocation3 + $0x30] sm:$0xf0]  ;;  %v1821_v26 = vld [vmem:[#allocation3 + $0x2c] sm:$0xf0] }
  0x15   :  { %2716 = vst [vmem:[#allocation18_spill] sm:$0xff] %v1795_v13  ;;  %v1823_v27 = vld [vmem:[#allocation3 + $0x30] sm:$0xf0]  ;;  %v1825_v28 = vld [vmem:[#allocation3 + $0x2c] sm:$0xf0] }
  0x16   :  { %2717 = vst [vmem:[#allocation19_spill] sm:$0xff] %v1797_v14  ;;  %v1827_v29 = vld [vmem:[#allocation3 + $0x38] sm:$0xf0]  ;;  %v1829_v30 = vld [vmem:[#allocation3 + $0x34] sm:$0xf0] }
  0x17   :  { %2718 = vst [vmem:[#allocation20_spill] sm:$0xff] %v1799_v15  ;;  %v1831_v31 = vld [vmem:[#allocation3 + $0x38] sm:$0xf0]  ;;  %v1833_v32 = vld [vmem:[#allocation3 + $0x34] sm:$0xf0] }
  0x18   :  { %2719 = vst [vmem:[#allocation21_spill] sm:$0xff] %v1801_v16  ;;  %v1835_v33 = vld [vmem:[#allocation3 + $0x44] sm:$0xf]  ;;  %v1837_v34 = vld [vmem:[#allocation3 + $0x40] sm:$0xf] }
  0x19   :  { %2720 = vst [vmem:[#allocation22_spill] sm:$0xff] %v1803_v17  ;;  %v1839_v35 = vld [vmem:[#allocation3 + $0x44] sm:$0xf]  ;;  %v1841_v36 = vld [vmem:[#allocation3 + $0x40] sm:$0xf] }
  0x1a   :  { %2721 = vst [vmem:[#allocation23_spill] sm:$0xff] %v1805_v18  ;;  %v1843_v37 = vld [vmem:[#allocation3 + $0x4c] sm:$0xf]  ;;  %v1845_v38 = vld [vmem:[#allocation3 + $0x48] sm:$0xf] }
  0x1b   :  { %2722 = vst [vmem:[#allocation24_spill] sm:$0xff] %v1807_v19  ;;  %v1847_v39 = vld [vmem:[#allocation3 + $0x4c] sm:$0xf]  ;;  %v1849_v40 = vld [vmem:[#allocation3 + $0x48] sm:$0xf] }
  0x1c   :  { %2723 = vst [vmem:[#allocation25_spill] sm:$0xff] %v1809_v20  ;;  %v1851_v41 = vld [vmem:[#allocation3 + $0x50] sm:$0xf0]  ;;  %v1853_v42 = vld [vmem:[#allocation3 + $0x4c] sm:$0xf0] }
  0x1d   :  { %2724 = vst [vmem:[#allocation26_spill] sm:$0xff] %v1811_v21  ;;  %v1855_v43 = vld [vmem:[#allocation3 + $0x50] sm:$0xf0]  ;;  %v1857_v44 = vld [vmem:[#allocation3 + $0x4c] sm:$0xf0] }
  0x1e   :  { %2725 = vst [vmem:[#allocation27_spill] sm:$0xff] %v1813_v22  ;;  %v1859_v45 = vld [vmem:[#allocation3 + $0x58] sm:$0xf0]  ;;  %v1861_v46 = vld [vmem:[#allocation3 + $0x54] sm:$0xf0] }
  0x1f   :  { %2726 = vst [vmem:[#allocation28_spill] sm:$0xff] %v1815_v23  ;;  %v1863_v47 = vld [vmem:[#allocation3 + $0x58] sm:$0xf0]  ;;  %v1865_v48 = vld [vmem:[#allocation3 + $0x54] sm:$0xf0] }
  0x20   :  { %2727 = vst [vmem:[#allocation29_spill] sm:$0xff] %v1817_v24  ;;  %v1867_v49 = vld [vmem:[#allocation3 + $0x64] sm:$0xf]  ;;  %v1869_v50 = vld [vmem:[#allocation3 + $0x60] sm:$0xf] }
  0x21   :  { %2728 = vst [vmem:[#allocation30_spill] sm:$0xff] %v1819_v25  ;;  %v1871_v51 = vld [vmem:[#allocation3 + $0x64] sm:$0xf]  ;;  %v1873_v52 = vld [vmem:[#allocation3 + $0x60] sm:$0xf] }
  0x22   :  { %2729 = vst [vmem:[#allocation31_spill] sm:$0xff] %v1821_v26  ;;  %v1875_v53 = vld [vmem:[#allocation3 + $0x6c] sm:$0xf]  ;;  %v1877_v54 = vld [vmem:[#allocation3 + $0x68] sm:$0xf] }
  0x23   :  { %2730 = vst [vmem:[#allocation32_spill] sm:$0xff] %v1823_v27  ;;  %v1879_v55 = vld [vmem:[#allocation3 + $0x6c] sm:$0xf]  ;;  %v1881_v56 = vld [vmem:[#allocation3 + $0x68] sm:$0xf] }
  0x24   :  { %2731 = vst [vmem:[#allocation33_spill] sm:$0xff] %v1825_v28  ;;  %v1883_v57 = vld [vmem:[#allocation3 + $0x70] sm:$0xf0]  ;;  %v1885_v58 = vld [vmem:[#allocation3 + $0x6c] sm:$0xf0] }
  0x25   :  { %2732 = vst [vmem:[#allocation34_spill] sm:$0xff] %v1827_v29  ;;  %v1887_v59 = vld [vmem:[#allocation3 + $0x70] sm:$0xf0]  ;;  %v1889_v60 = vld [vmem:[#allocation3 + $0x6c] sm:$0xf0] }
  0x26   :  { %2733 = vst [vmem:[#allocation35_spill] sm:$0xff] %v1829_v30  ;;  %v1891_v61 = vld [vmem:[#allocation3 + $0x78] sm:$0xf0]  ;;  %v1893_v62 = vld [vmem:[#allocation3 + $0x74] sm:$0xf0] }
  0x27   :  { %2734 = vst [vmem:[#allocation36_spill] sm:$0xff] %v1835_v33  ;;  %v1895_v63 = vld [vmem:[#allocation3 + $0x78] sm:$0xf0]  ;;  %v1897_v0 = vld [vmem:[#allocation3 + $0x74] sm:$0xf0] }
  0x28   :  { %2735 = vst [vmem:[#allocation37_spill] sm:$0xff] %v1837_v34  ;;  %v1899_v5 = vld [vmem:[#allocation3 + $0x84] sm:$0xf]  ;;  %v1901_v13 = vld [vmem:[#allocation3 + $0x80] sm:$0xf] }
  0x29   :  { %2736 = vst [vmem:[#allocation38_spill] sm:$0xff] %v1843_v37  ;;  %v1903_v14 = vld [vmem:[#allocation3 + $0x84] sm:$0xf]  ;;  %v1905_v6 = vld [vmem:[#allocation3 + $0x80] sm:$0xf] }
  0x2a   :  { %2737 = vst [vmem:[#allocation39_spill] sm:$0xff] %v1845_v38  ;;  %v1907_v1 = vld [vmem:[#allocation3 + $0x8c] sm:$0xf]  ;;  %v1909_v9 = vld [vmem:[#allocation3 + $0x88] sm:$0xf] }
  0x2b   :  { %2738 = vst [vmem:[#allocation40_spill] sm:$0xff] %v1851_v41  ;;  %v1911_v10 = vld [vmem:[#allocation3 + $0x8c] sm:$0xf]  ;;  %v1913_v2 = vld [vmem:[#allocation3 + $0x88] sm:$0xf] }
  0x2c   :  { %2739 = vst [vmem:[#allocation41_spill] sm:$0xff] %v1853_v42  ;;  %v1915_v21 = vld [vmem:[#allocation3 + $0x90] sm:$0xf0]  ;;  %v1917_v29 = vld [vmem:[#allocation3 + $0x8c] sm:$0xf0] }
  0x2d   :  { %2740 = vst [vmem:[#allocation42_spill] sm:$0xff] %v1859_v45  ;;  %v1919_v30 = vld [vmem:[#allocation3 + $0x90] sm:$0xf0]  ;;  %v1921_v22 = vld [vmem:[#allocation3 + $0x8c] sm:$0xf0] }
  0x2e   :  { %2741 = vst [vmem:[#allocation43_spill] sm:$0xff] %v1861_v46  ;;  %v1923_v17 = vld [vmem:[#allocation3 + $0x98] sm:$0xf0]  ;;  %v1925_v25 = vld [vmem:[#allocation3 + $0x94] sm:$0xf0] }
  0x2f   :  { %2742 = vst [vmem:[#allocation44_spill] sm:$0xff] %v1867_v49  ;;  %v1927_v26 = vld [vmem:[#allocation3 + $0x98] sm:$0xf0]  ;;  %v1929_v18 = vld [vmem:[#allocation3 + $0x94] sm:$0xf0] }
  0x30   :  { %2743 = vst [vmem:[#allocation45_spill] sm:$0xff] %v1869_v50  ;;  %v1931_v37 = vld [vmem:[#allocation3 + $0xa4] sm:$0xf]  ;;  %v1933_v45 = vld [vmem:[#allocation3 + $0xa0] sm:$0xf] }
  0x31   :  { %2744 = vst [vmem:[#allocation46_spill] sm:$0xff] %v1875_v53  ;;  %v1935_v46 = vld [vmem:[#allocation3 + $0xa4] sm:$0xf]  ;;  %v1937_v38 = vld [vmem:[#allocation3 + $0xa0] sm:$0xf] }
  0x32   :  { %2745 = vst [vmem:[#allocation47_spill] sm:$0xff] %v1877_v54  ;;  %v1939_v33 = vld [vmem:[#allocation3 + $0xac] sm:$0xf]  ;;  %v1941_v41 = vld [vmem:[#allocation3 + $0xa8] sm:$0xf] }
  0x33   :  { %2746 = vst [vmem:[#allocation48_spill] sm:$0xff] %v1883_v57  ;;  %v1943_v42 = vld [vmem:[#allocation3 + $0xac] sm:$0xf]  ;;  %v1945_v34 = vld [vmem:[#allocation3 + $0xa8] sm:$0xf] }
  0x34   :  { %2747 = vst [vmem:[#allocation49_spill] sm:$0xff] %v1885_v58  ;;  %v1947_v53 = vld [vmem:[#allocation3 + $0xb0] sm:$0xf0]  ;;  %v1953_v54 = vld [vmem:[#allocation3 + $0xac] sm:$0xf0] }
  0x35   :  { %2748 = vst [vmem:[#allocation50_spill] sm:$0xff] %v1891_v61  ;;  %v1949_v61 = vld [vmem:[#allocation3 + $0xac] sm:$0xf0]  ;;  %v1955_v49 = vld [vmem:[#allocation3 + $0xb8] sm:$0xf0] }
  0x36   :  { %2749 = vst [vmem:[#allocation51_spill] sm:$0xff] %v1893_v62  ;;  %v1951_v62 = vld [vmem:[#allocation3 + $0xb0] sm:$0xf0]  ;;  %v1957_v57 = vld [vmem:[#allocation3 + $0xb4] sm:$0xf0] }
  0x37   :  { %2750 = vst [vmem:[#allocation52_spill] sm:$0xff] %v1897_v0  ;;  %v1959_v58 = vld [vmem:[#allocation3 + $0xb8] sm:$0xf0]  ;;  %v1961_v50 = vld [vmem:[#allocation3 + $0xb4] sm:$0xf0] }
  0x38   :  { %2751 = vst [vmem:[#allocation53_spill] sm:$0xff] %v1899_v5  ;;  %v1971_v5 = vld [vmem:[#allocation3 + $0xcc] sm:$0xf]  ;;  %v2013_v15 = vld [vmem:[#allocation3 + $0xec] sm:$0xf0] }
  0x39   :  { %2752 = vst [vmem:[#allocation54_spill] sm:$0xff] %v1901_v13  ;;  %v1977_v13 = vld [vmem:[#allocation3 + $0xc8] sm:$0xf]  ;;  %v2007_v7 = vld [vmem:[#allocation3 + $0xec] sm:$0xf] }
  0x3a   :  { %2753 = vst [vmem:[#allocation55_spill] sm:$0xff] %v1903_v14  ;;  %v2015_v16 = vld [vmem:[#allocation3 + $0xf0] sm:$0xf0]  ;;  %v2021_v8 = vld [vmem:[#allocation3 + $0xf4] sm:$0xf0] }
  0x3b   :  { %2754 = vst [vmem:[#allocation56_spill] sm:$0xff] %v1905_v6  ;;  %v2023_v3 = vld [vmem:[#allocation3 + $0xf8] sm:$0xf0] }
  0x3c   :  { %2755 = vst [vmem:[#allocation57_spill] sm:$0xff] %v1907_v1  ;;  %v1963_v1 = vld [vmem:[#allocation3 + $0xc4] sm:$0xf] }
  0x3d   :  { %2756 = vst [vmem:[#allocation58_spill] sm:$0xff] %v1909_v9  ;;  %v1969_v9 = vld [vmem:[#allocation3 + $0xc0] sm:$0xf] }
  0x3e   :  { %2757 = vst [vmem:[#allocation59_spill] sm:$0xff] %v1911_v10 }
  0x3f   :  { %2758 = vst [vmem:[#allocation60_spill] sm:$0xff] %v1913_v2 }
  0x40   :  { %2759 = vst [vmem:[#allocation61_spill] sm:$0xff] %v1915_v21  ;;  %v1973_v21 = vld [vmem:[#allocation3 + $0xc8] sm:$0xf] }
  0x41   :  { %2760 = vst [vmem:[#allocation62_spill] sm:$0xff] %v1917_v29  ;;  %v1975_v29 = vld [vmem:[#allocation3 + $0xcc] sm:$0xf] }
  0x42   :  { %2761 = vst [vmem:[#allocation63_spill] sm:$0xff] %v1921_v22 }
  0x43   :  { %2762 = vst [vmem:[#allocation64_spill] sm:$0xff] %v1923_v17  ;;  %v1965_v17 = vld [vmem:[#allocation3 + $0xc0] sm:$0xf] }
  0x44   :  { %2763 = vst [vmem:[#allocation65_spill] sm:$0xff] %v1925_v25  ;;  %v1967_v25 = vld [vmem:[#allocation3 + $0xc4] sm:$0xf] }
  0x45   :  { %2764 = vst [vmem:[#allocation66_spill] sm:$0xff] %v1927_v26 }
  0x46   :  { %2765 = vst [vmem:[#allocation67_spill] sm:$0xff] %v1929_v18 }
  0x47   :  { %2766 = vst [vmem:[#allocation68_spill] sm:$0xff] %v1931_v37  ;;  %v1987_v37 = vld [vmem:[#allocation3 + $0xd8] sm:$0xf0] }
  0x48   :  { %2767 = vst [vmem:[#allocation69_spill] sm:$0xff] %v1933_v45  ;;  %v1993_v45 = vld [vmem:[#allocation3 + $0xd4] sm:$0xf0] }
  0x49   :  { %2768 = vst [vmem:[#allocation70_spill] sm:$0xff] %v1939_v33  ;;  %v1979_v33 = vld [vmem:[#allocation3 + $0xd0] sm:$0xf0] }
  0x4a   :  { %2769 = vst [vmem:[#allocation71_spill] sm:$0xff] %v1941_v41  ;;  %v1985_v41 = vld [vmem:[#allocation3 + $0xcc] sm:$0xf0] }
  0x4b   :  { %2770 = vst [vmem:[#allocation72_spill] sm:$0xff] %v1947_v53  ;;  %v1989_v53 = vld [vmem:[#allocation3 + $0xd4] sm:$0xf0] }
  0x4c   :  { %2771 = vst [vmem:[#allocation73_spill] sm:$0xff] %v1949_v61  ;;  %v1991_v61 = vld [vmem:[#allocation3 + $0xd8] sm:$0xf0] }
  0x4d   :  { %2772 = vst [vmem:[#allocation74_spill] sm:$0xff] %v1955_v49  ;;  %v1981_v49 = vld [vmem:[#allocation3 + $0xcc] sm:$0xf0] }
  0x4e   :  { %2773 = vst [vmem:[#allocation75_spill] sm:$0xff] %v1957_v57  ;;  %v1983_v57 = vld [vmem:[#allocation3 + $0xd0] sm:$0xf0] }
  0x4f   :  { %2774 = vst [vmem:[#allocation76_spill] sm:$0xff] %v1963_v1  ;;  %v1999_v1 = vld [vmem:[#allocation3 + $0xe4] sm:$0xf] }
  0x50   :  { %2775 = vst [vmem:[#allocation77_spill] sm:$0xff] %v1965_v17  ;;  %v2005_v17 = vld [vmem:[#allocation3 + $0xe8] sm:$0xf] }
  0x51   :  { %2776 = vst [vmem:[#allocation78_spill] sm:$0xff] %v1967_v25 }
  0x52   :  { %2777 = vst [vmem:[#allocation79_spill] sm:$0xff] %v1969_v9 }
  0x53   :  { %2778 = vst [vmem:[#allocation80_spill] sm:$0xff] %v1971_v5  ;;  %v1995_v5 = vld [vmem:[#allocation3 + $0xe4] sm:$0xf] }
  0x54   :  { %2779 = vst [vmem:[#allocation81_spill] sm:$0xff] %v1973_v21  ;;  %v1997_v21 = vld [vmem:[#allocation3 + $0xe0] sm:$0xf] }
  0x55   :  { %2780 = vst [vmem:[#allocation82_spill] sm:$0xff] %v1977_v13 }
  0x56   :  { %2781 = vst [vmem:[#allocation83_spill] sm:$0xff] %v1979_v33  ;;  %v2001_v33 = vld [vmem:[#allocation3 + $0xe0] sm:$0xf] }
  0x57   :  { %2782 = vst [vmem:[#allocation84_spill] sm:$0xff] %v1981_v49  ;;  %v2003_v49 = vld [vmem:[#allocation3 + $0xec] sm:$0xf] }
  0x58   :  { %2783 = vst [vmem:[#allocation85_spill] sm:$0xff] %v1987_v37  ;;  %v2009_v37 = vld [vmem:[#allocation3 + $0xe8] sm:$0xf] }
  0x59   :  { %2784 = vst [vmem:[#allocation86_spill] sm:$0xff] %v1989_v53  ;;  %v2011_v53 = vld [vmem:[#allocation3 + $0xf0] sm:$0xf0] }
  0x5a   :  { %2785 = vst [vmem:[#allocation87_spill] sm:$0xff] %v1995_v5  ;;  %v2017_v5 = vld [vmem:[#allocation3 + $0xec] sm:$0xf0] }
  0x5b   :  { %2786 = vst [vmem:[#allocation88_spill] sm:$0xff] %v1997_v21  ;;  %v2019_v21 = vld [vmem:[#allocation3 + $0xf8] sm:$0xf0] }
  0x5c   :  { %2787 = vst [vmem:[#allocation89_spill] sm:$0xff] %v1999_v1 }
  0x5d   :  { %2788 = vst [vmem:[#allocation90_spill] sm:$0xff] %v2003_v49  ;;  %v2025_v49 = vld [vmem:[#allocation3 + $0xf4] sm:$0xf0] }
  0x5e   :  { %2789 = vst [vmem:[#allocation91_spill] sm:$0xff] %v2005_v17  ;;  %v2030_v17 = vld [vmem:[%s2691_s1] sm:$0xf] }
  0x5f   :  { %2790 = vst [vmem:[#allocation92_spill] sm:$0xff] %v2007_v7 }
  0x60   :  { %2791 = vst [vmem:[#allocation93_spill] sm:$0xff] %v2011_v53  ;;  %v2035_v53 = vld [vmem:[%s2692_s2] sm:$0xf] }
  0x61   :  { %2792 = vst [vmem:[#allocation94_spill] sm:$0xff] %v2013_v15  ;;  %v2044_v15 = vmov 0.0  }
  0x62   :  { %2793 = vst [vmem:[#allocation95_spill] sm:$0xff] %v2015_v16 }
  0x63   :  { %2794 = vst [vmem:[#allocation96_spill] sm:$0xff] %v2017_v5 }
  0x64   :  { %2795 = vst [vmem:[#allocation97_spill] sm:$0xff] %v2019_v21  ;;  %v2040_v21 = vld [vmem:[%s2694_s4] sm:$0x1] }
  0x65   :  { %2796 = vst [vmem:[#allocation98_spill] sm:$0xff] %v2021_v8  ;;  %v2042_v8 = vld [vmem:[#allocation2] sm:$0x1] }
  0x66   :  { %2797 = vst [vmem:[#allocation99_spill] sm:$0xff] %v2023_v3 }
  0x67   :  { %2798 = vst [vmem:[#allocation100_spill] sm:$0xff] %v2030_v17 }
  0x68   :  { %2799 = vst [vmem:[#allocation101_spill] sm:$0xff] %v2035_v53 }
  0x69   :  { %2800 = vst [vmem:[#allocation102_spill] sm:$0xff] %v2040_v21 }
  0x6a   :  { %2801 = vst [vmem:[#allocation103_spill] sm:$0xff] %v2042_v8 }
  0x6b LB: > { %2802 = vst [vmem:[#allocation104_spill] sm:$0xff] %v1715_v15  ;;  %v2804_v5 = vld [vmem:[#allocation96_spill] sm:$0xff]  ;;  %v2805_v16 = vld [vmem:[#allocation95_spill] sm:$0xff]  ;;  %v2806_v1 = vld [vmem:[#allocation89_spill] sm:$0xff]  ;;  %v1352_v53 = vor.u32 %v2025_v49, %v2009_v37  ;;  %s1228_s1 = sshll.u32 %s1723_s10, 3  ;;  %s82_s10 = sadd.s32 1, %s1723_s10   ;;  %s1723_s10 = sphi %s2048_s10, %s82_s10   ;;  %v1719_v11 = vphi %v2046_v11, %v2842_v11   ;;  %v1715_v15 = vphi %v2044_v15, %v2841_v15  }
  0x6c   : > { %2803 = vst [vmem:[#allocation105_spill] sm:$0xff] %v1719_v11  ;;  %v1344_v8 = vor.u32 %v2804_v5, %v2001_v33  ;;  %v1348_v21 = vor.u32 %v2806_v1, %v2805_v16  ;;  %v2808_v7 = vld [vmem:[#allocation92_spill] sm:$0xff]  ;;  %v2809_v9 = vld [vmem:[#allocation79_spill] sm:$0xff]  ;;  %v2810_v25 = vld [vmem:[#allocation78_spill] sm:$0xff]  ;;  %v1340_v5 = vor.u32 %v1975_v29, %v1991_v61  ;;  %s86_s11 = scalar_lea.vmem %s2690_s0, %s1228_s1  ;;  %p79_p0 = scmp.ge.s32.totalorder %s82_s10, 23  }
  0x6d   : > { %v2807_v3 = vld [vmem:[#allocation99_spill] sm:$0xff]  ;;  %v1328_v15 = vor.u32 %v1985_v41, %v2809_v9  ;;  %v1332_v11 = vor.u32 %v2810_v25, %v1983_v57  ;;  %306 = vmatpush.bf16.msra.mxu2 %v1352_v53  ;;  %v2811_v13 = vld [vmem:[#allocation82_spill] sm:$0xff]  ;;  %v2812_v6 = vld [vmem:[#allocation56_spill] sm:$0xff]  ;;  %vm632_vm0 = vcmask (%p79_p0), 7168  }
  0x6e   : > { %v1356_v17 = vor.u32 %v2808_v7, %v2807_v3  ;;  %280 = vmatpush.bf16.msra.mxu0 %v1344_v8  ;;  %293 = vmatpush.bf16.msra.mxu1 %v1348_v21  ;;  %v1336_v1 = vor.u32 %v1993_v45, %v2811_v13  ;;  %v1312_v8 = vor.u32 %v1953_v54, %v1937_v38  ;;  %v87_v53 = vld [vmem:[%s86_s11] sm:$0xff]  ;;  %v1728_v7 = vmov 0   ;;  %v2813_v22 = vld [vmem:[#allocation63_spill] sm:$0xff]  ;;  %v2815_v2 = vld [vmem:[#allocation60_spill] sm:$0xff] }
  0x6f   : > { %v1316_v21 = vor.u32 %v1935_v46, %v1951_v62  ;;  %v1324_v3 = vor.u32 %v1943_v42, %v1959_v58  ;;  %1591 = vset.pattern.permute.xlu0 %v1728_v7  ;;  %v2814_v14 = vld [vmem:[#allocation55_spill] sm:$0xff]  ;;  %v2817_v26 = vld [vmem:[#allocation66_spill] sm:$0xff]  ;;  %v1280_v7 = vor.u32 %v1889_v60, %v1873_v52  ;;  %v2819_v0 = vld [vmem:[#allocation52_spill] sm:$0xff]  ;;  %v1729_v42 = vmov (%p79_p0), 0  }
  0x70   : > { %319 = vmatpush.bf16.msra.mxu3 %v1356_v17  ;;  %v1320_v17 = vor.u32 %v1961_v50, %v1945_v34  ;;  %90 = vperm.xlu0 %1591, %v87_v53   ;;  %v2816_v18 = vld [vmem:[#allocation67_spill] sm:$0xff]  ;;  %v1264_v53 = vor.u32 %v1857_v44, %v1841_v36  ;;  %v2820_v20 = vld [vmem:[#allocation25_spill] sm:$0xff]  ;;  %v2822_v27 = vld [vmem:[#allocation32_spill] sm:$0xff] }
  0x71   : > { %307 = vmatpush.bf16.msra.mxu2 %v1336_v1  ;;  %v1304_v1 = vor.u32 %v2816_v18, %v2815_v2  ;;  %v2818_v10 = vld [vmem:[#allocation59_spill] sm:$0xff]  ;;  %v2821_v28 = vld [vmem:[#allocation33_spill] sm:$0xff]  ;;  %v2823_v19 = vld [vmem:[#allocation24_spill] sm:$0xff]  ;;  %1603 = vset.pattern.permute.xlu1 (%p79_p0), %v1729_v42 }
  0x72   : > { %281 = vmatpush.bf16.msra.mxu0 %v1328_v15  ;;  %294 = vmatpush.bf16.msra.mxu1 %v1332_v11  ;;  %v1296_v11 = vor.u32 %v2813_v22, %v2812_v6  ;;  %v1300_v15 = vor.u32 %v2814_v14, %v1919_v30  ;;  %v2824_v24 = vld [vmem:[#allocation29_spill] sm:$0xff]  ;;  %v2825_v23 = vld [vmem:[#allocation28_spill] sm:$0xff]  ;;  %v2856_v37 = vld [vmem:[#allocation86_spill] sm:$0xff] (%p79_p0) }
  0x73   : > { %v2826_v4 = vld [vmem:[#allocation9_spill] sm:$0xff]  ;;  %v2833_v6 = vld [vmem:[#allocation12_spill] sm:$0xff]  ;;  %v2863_v49 = vld [vmem:[#allocation71_spill] sm:$0xff] (%p79_p0)  ;;  %1604 = vset.pattern.permute.xlu2 (%p79_p0), %v1729_v42 }
  0x74   : > { %320 = vmatpush.bf16.msra.mxu3 %v1340_v5  ;;  %v1308_v5 = vor.u32 %v2818_v10, %v2817_v26  ;;  %v2827_v12 = vld [vmem:[#allocation17_spill] sm:$0xff]  ;;  %v2834_v10 = vld [vmem:[#allocation105_spill] sm:$0xff]  ;;  %v2852_v30 = vld [vmem:[#allocation84_spill] sm:$0xff] (%p79_p0) }
  0x75   : > { %308 = vmatpush.bf16.msra.mxu2 %v1320_v17  ;;  %v1268_v17 = vor.u32 %v1839_v35, %v1855_v43  ;;  %v2831_v2 = vld [vmem:[#allocation21_spill] sm:$0xff]  ;;  %v119_v13 = vpack.c.bf16 %v2834_v10, %v2834_v10  ;;  %v2854_v33 = vld [vmem:[#allocation76_spill] sm:$0xff] (%p79_p0)  ;;  %v2864_v50 = vld [vmem:[#allocation75_spill] sm:$0xff] (%p79_p0) }
  0x76   : > { %282 = vmatpush.bf16.msra.mxu0 %v1312_v8  ;;  %295 = vmatpush.bf16.msra.mxu1 %v1316_v21  ;;  %v1284_v8 = vor.u32 %v1871_v51, %v1887_v59  ;;  %v1288_v21 = vor.u32 %v2819_v0, %v1881_v56  ;;  %v2830_v0 = vld [vmem:[#allocation13_spill] sm:$0xff]  ;;  %v2861_v46 = vld [vmem:[#allocation72_spill] sm:$0xff] (%p79_p0)  ;;  %v2229_v51 = vor.u32 (%p79_p0), %v2864_v50, %v2863_v49  ;;  %v2865_v52 = vld [vmem:[#allocation74_spill] sm:$0xff] (%p79_p0) }
  0x77   : > { %v2836_v10 = vld [vmem:[#allocation101_spill] sm:$0xff]  ;;  %v2866_v54 = vld [vmem:[#allocation70_spill] sm:$0xff] (%p79_p0)  ;;  %v2892_v49 = vld [vmem:[#allocation31_spill] sm:$0xff] (%p79_p0) }
  0x78   : > { %321 = vmatpush.bf16.msra.mxu3 %v1324_v3  ;;  %v1292_v3 = vor.u32 %v1879_v55, %v1895_v63  ;;  %v2154_v16 = vperm.slane %v2836_v10, 2  ;;  %v2838_v26 = vld [vmem:[#allocation104_spill] sm:$0xff]  ;;  %1602 = vset.pattern.permute.xlu0 (%p79_p0), %v1729_v42  ;;  %v2233_v55 = vor.u32 (%p79_p0), %v2866_v54, %v2865_v52  ;;  %v2867_v56 = vld [vmem:[#allocation54_spill] sm:$0xff] (%p79_p0) }
  0x79   : > { %309 = vmatpush.bf16.msra.mxu2 %v1304_v1  ;;  %v1248_v1 = vor.u32 %v2821_v28, %v2820_v20  ;;  %v2851_v29 = vld [vmem:[#allocation77_spill] sm:$0xff] (%p79_p0)  ;;  %v2868_v57 = vld [vmem:[#allocation62_spill] sm:$0xff] (%p79_p0) }
  0x7a   : > { %283 = vmatpush.bf16.msra.mxu0 %v1296_v11  ;;  %296 = vmatpush.bf16.msra.mxu1 %v1300_v15  ;;  %v1272_v11 = vor.u32 %v1865_v48, %v1849_v40  ;;  %v1276_v15 = vor.u32 %v1847_v39, %v1863_v47  ;;  %v1357_v35 = vld [vmem:[%s2690_s0 + $0xb8] sm:$0xff] (%p79_p0)  ;;  %v2239_v58 = vor.u32 (%p79_p0), %v2868_v57, %v2867_v56  ;;  %v1486_v62 = vld [vmem:[%s2690_s0 + $0xc0] sm:$0xff] (%p79_p0)  ;;  %v2895_v57 = vld [vmem:[#allocation27_spill] sm:$0xff] (%p79_p0) }
  0x7b   :  { %v2855_v36 = vld [vmem:[#allocation81_spill] sm:$0xff] (%p79_p0)  ;;  %v2858_v40 = vld [vmem:[#allocation80_spill] sm:$0xff] (%p79_p0)  ;;  %358 = vperm.xlu0 (%p79_p0), %1602, %v1357_v35   ;;  %v2871_v63 = vld [vmem:[#allocation58_spill] sm:$0xff] (%p79_p0) }
  0x7c   : > { %322 = vmatpush.bf16.msra.mxu3 %v1308_v5  ;;  %v1252_v5 = vor.u32 %v2823_v19, %v2822_v27  ;;  %v2209_v38 = vor.u32 (%p79_p0), %v2856_v37, %v2855_v36  ;;  %v2857_v39 = vld [vmem:[#allocation85_spill] sm:$0xff] (%p79_p0)  ;;  %v2862_v47 = vld [vmem:[#allocation68_spill] sm:$0xff] (%p79_p0)  ;;  %v2893_v52 = vld [vmem:[#allocation30_spill] sm:$0xff] (%p79_p0) }
  0x7d   : > { %310 = vmatpush.bf16.msra.mxu2 %v1288_v21  ;;  %v1232_v21 = vor.u32 %v2827_v12, %v2826_v4  ;;  %v2213_v41 = vor.u32 (%p79_p0), %v2858_v40, %v2857_v39  ;;  %v2859_v43 = vld [vmem:[#allocation69_spill] sm:$0xff] (%p79_p0)  ;;  %v2223_v48 = vor.u32 (%p79_p0), %v2862_v47, %v2861_v46  ;;  %v2885_v35 = vld [vmem:[#allocation40_spill] sm:$0xff] (%p79_p0)  ;;  %v2887_v39 = vld [vmem:[#allocation39_spill] sm:$0xff] (%p79_p0) }
  0x7e   : > { %284 = vmatpush.bf16.msra.mxu0 %v1280_v7  ;;  %297 = vmatpush.bf16.msra.mxu1 %v1284_v8  ;;  %v1256_v7 = vor.u32 %v1833_v32, %v2824_v24  ;;  %v1260_v8 = vor.u32 %v2825_v23, %v1831_v31  ;;  %v2196_v31 = vor.u32 (%p79_p0), %v2852_v30, %v2851_v29  ;;  %v2853_v32 = vld [vmem:[#allocation83_spill] sm:$0xff] (%p79_p0)  ;;  %v2860_v44 = vld [vmem:[#allocation73_spill] sm:$0xff] (%p79_p0)  ;;  %v2886_v36 = vld [vmem:[#allocation36_spill] sm:$0xff] (%p79_p0) }
  0x7f   :  { %v2200_v34 = vor.u32 (%p79_p0), %v2854_v33, %v2853_v32  ;;  %v2219_v45 = vor.u32 (%p79_p0), %v2860_v44, %v2859_v43  ;;  %v2869_v59 = vld [vmem:[#allocation61_spill] sm:$0xff] (%p79_p0)  ;;  %v2286_v37 = vor.u32 (%p79_p0), %v2886_v36, %v2885_v35  ;;  %v2888_v40 = vld [vmem:[#allocation43_spill] sm:$0xff] (%p79_p0)  ;;  %v2889_v43 = vld [vmem:[#allocation42_spill] sm:$0xff] (%p79_p0) }
  0x80   : > { %323 = vmatpush.bf16.msra.mxu3 %v1292_v3  ;;  %v2828_v3 = vld [vmem:[#allocation16_spill] sm:$0xff]  ;;  %v2870_v60 = vld [vmem:[#allocation53_spill] sm:$0xff] (%p79_p0)  ;;  %v2292_v42 = vor.u32 (%p79_p0), %v2888_v40, %v2887_v39  ;;  %v2890_v44 = vld [vmem:[#allocation38_spill] sm:$0xff] (%p79_p0) }
  0x81   : > { %311 = vmatpush.bf16.msra.mxu2 %v1272_v11  ;;  %v1240_v11 = vor.u32 %v2831_v2, %v2830_v0  ;;  %v2243_v61 = vor.u32 (%p79_p0), %v2870_v60, %v2869_v59  ;;  %v2883_v30 = vld [vmem:[#allocation37_spill] sm:$0xff] (%p79_p0)  ;;  %v2296_v46 = vor.u32 (%p79_p0), %v2890_v44, %v2889_v43  ;;  %v2891_v47 = vld [vmem:[#allocation23_spill] sm:$0xff] (%p79_p0)  ;;  %v2894_v54 = vld [vmem:[#allocation22_spill] sm:$0xff] (%p79_p0) }
  0x82   : > { %285 = vmatpush.bf16.msra.mxu0 %v1264_v53  ;;  %298 = vmatpush.bf16.msra.mxu1 %v1268_v17  ;;  %v2829_v53 = vld [vmem:[#allocation8_spill] sm:$0xff]  ;;  %v2884_v32 = vld [vmem:[#allocation41_spill] sm:$0xff] (%p79_p0)  ;;  %v2302_v50 = vor.u32 (%p79_p0), %v2892_v49, %v2891_v47  ;;  %v2306_v56 = vor.u32 (%p79_p0), %v2894_v54, %v2893_v52  ;;  %v2896_v59 = vld [vmem:[#allocation35_spill] sm:$0xff] (%p79_p0) }
  0x83   : > { %v1236_v17 = vor.u32 %v2829_v53, %v2828_v3  ;;  %638 = vperm.xlu0 (%p79_p0), %1602, %v1486_v62   ;;  %v2282_v33 = vor.u32 (%p79_p0), %v2884_v32, %v2883_v30  ;;  %v2312_v60 = vor.u32 (%p79_p0), %v2896_v59, %v2895_v57  ;;  %v2897_v62 = vld [vmem:[#allocation34_spill] sm:$0xff] (%p79_p0) }
  0x84   : > { %324 = vmatpush.bf16.msra.mxu3 %v1276_v15  ;;  %v2832_v15 = vld [vmem:[#allocation20_spill] sm:$0xff]  ;;  %v2906_v30 = vld [vmem:[#allocation10_spill] sm:$0xff] (%p79_p0) }
  0x85   : > { %312 = vmatpush.bf16.msra.mxu2 %v1256_v7  ;;  %v1244_v9 = vor.u32 %v2833_v6, %v2832_v15  ;;  %v1488_v59 = vld [vmem:[%s2690_s0 + $0xc8] sm:$0xff] (%p79_p0) }
  0x86   : > { %286 = vmatpush.bf16.msra.mxu0 %v1248_v1  ;;  %299 = vmatpush.bf16.msra.mxu1 %v1252_v5  ;;  %v2835_v1 = vld [vmem:[#allocation100_spill] sm:$0xff] }
  0x87   : > { %v2130_v5 = vperm.slane %v2835_v1, 0  ;;  %v2133_v7 = vperm.slane %v2835_v1, 1  ;;  %v2146_v3 = vperm.slane %v2835_v1, 2  ;;  %v2149_v53 = vperm.slane %v2835_v1, 3  ;;  %734 = vperm.xlu1 (%p79_p0), %1603, %v1488_v59  }
  0x88   : > { %325 = vmatpush.bf16.msra.mxu3 %v1260_v8  ;;  %v2138_v8 = vperm.slane %v2836_v10, 0 }
  0x89   : > { %313 = vmatpush.bf16.msra.mxu2 %v1240_v11 }
  0x8a   : > { %287 = vmatpush.bf16.msra.mxu0 %v1232_v21  ;;  %300 = vmatpush.bf16.msra.mxu1 %v1236_v17 }
  0x8c   : > { %326 = vmatpush.bf16.msra.mxu3 %v1244_v9  ;;  %314 = vmatmul.bf16.vlgmr.msra.gmra.mxu2 %v119_v13  ;;  %v2141_v9 = vperm.slane %v2836_v10, 1 }
  0x8d   : > { %288 = vmatmul.bf16.vlgmr.msra.gmra.mxu0 %v119_v13  ;;  %301 = vmatmul.bf16.vlgmr.msra.gmra.mxu1 %v119_v13 }
  0x8f   : > { %327 = vmatmul.bf16.vlgmr.msra.gmra.mxu3 %v119_v13 }
  0xe2   : > { %v91_v2 = vpop.permute.xlu0 %90 }
  0xe3   : > { %v102_v6 = vmul.f32 %v2130_v5, %v91_v2  ;;  %v103_v0 = vmul.f32 %v2133_v7, %v91_v2  ;;  %v104_v12 = vmul.f32 %v2146_v3, %v91_v2  ;;  %v105_v14 = vmul.f32 %v2149_v53, %v91_v2 }
  0xe5   : > { %v115_v21 = vadd.f32 %v2138_v8, %v102_v6  ;;  %v116_v13 = vadd.f32 %v2141_v9, %v103_v0  ;;  %v2157_v6 = vperm.slane %v2836_v10, 3  ;;  %v117_v1 = vadd.f32 %v2154_v16, %v104_v12 }
  0xe7   : > { %2837 = vst [vmem:[#allocation106_spill] sm:$0xff] %v2157_v6  ;;  %v118_v19 = vadd.f32 %v2157_v6, %v105_v14 }
 0x10a   : > { %v289_v17 = vpop.f32.mrf.mxu0  ;;  %v302_v11 = vpop.f32.mrf.mxu1 }
 0x10b   : > { %v332_v15 = vadd.f32 %v289_v17, %v115_v21  ;;  %v333_v4 = vadd.f32 %v302_v11, %v116_v13 }
 0x10d   : > { %v336_v0 = vmul.f32 0.5, %v332_v15  ;;  %v340_v18 = vmul.f32 0.5, %v333_v4 }
 0x10f   : > { %1592 = vtanh.f32 %v336_v0  ;;  %v315_v21 = vpop.f32.mrf.mxu2 }
 0x110   : > { %1594 = vtanh.f32 %v340_v18  ;;  %v334_v17 = vadd.f32 %v315_v21, %v117_v1 }
 0x112   : > { %v328_v13 = vpop.f32.mrf.mxu3  ;;  %v291_v20 = vpop.f32.mrf.mxu0  ;;  %1596 = vtanh.f32 %v334_v17 }
 0x113   : > { %v335_v11 = vadd.f32 %v328_v13, %v118_v19  ;;  %v304_v2 = vpop.f32.mrf.mxu1  ;;  %v2848_v13 = vld [vmem:[#allocation98_spill] sm:$0xff] (%p79_p0) }
 0x114   :  { %v2850_v2 = vld [vmem:[#allocation90_spill] sm:$0xff] (%p79_p0) }
 0x115   : > { %v344_v22 = vmul.f32 0.5, %v335_v11  ;;  %v1593_v23 = vpop.eup %1592 }
 0x116   : > { %v1595_v24 = vpop.eup %1594  ;;  %v338_v10 = vmul.f32 0.5, %v1593_v23 }
 0x117   : > { %v342_v25 = vmul.f32 0.5, %v1595_v24  ;;  %1598 = vtanh.f32 %v344_v22  ;;  %v317_v18 = vpop.f32.mrf.mxu2  ;;  %v2843_v22 = vld [vmem:[#allocation88_spill] sm:$0xff] (%p79_p0)  ;;  %v2844_v24 = vld [vmem:[#allocation94_spill] sm:$0xff] (%p79_p0) }
 0x118   : > { %v339_v4 = vadd.f32 0.5, %v338_v10  ;;  %v1597_v12 = vpop.eup %1596  ;;  %v2847_v10 = vld [vmem:[#allocation91_spill] sm:$0xff] (%p79_p0) }
 0x119   : > { %v343_v15 = vadd.f32 0.5, %v342_v25  ;;  %v2178_v25 = vor.u32 (%p79_p0), %v2844_v24, %v2843_v22  ;;  %v2186_v17 = vor.u32 (%p79_p0), %v2848_v13, %v2847_v10  ;;  %v2877_v22 = vld [vmem:[#allocation48_spill] sm:$0xff] (%p79_p0)  ;;  %v2880_v10 = vld [vmem:[#allocation51_spill] sm:$0xff] (%p79_p0) }
 0x11a   : > { %v330_v0 = vpop.f32.mrf.mxu3  ;;  %v350_v27 = vmul.f32 %v1597_v12, %v339_v4  ;;  %v2874_v12 = vld [vmem:[#allocation57_spill] sm:$0xff] (%p79_p0)  ;;  %v2878_v24 = vld [vmem:[#allocation44_spill] sm:$0xff] (%p79_p0) }
 0x11b   : > { %v349_v14 = vmul.f32 %v2838_v26, %v343_v15  ;;  %v2845_v26 = vld [vmem:[#allocation93_spill] sm:$0xff] (%p79_p0)  ;;  %548 = vmatpush.bf16.msra.mxu0 (%p79_p0), %v2178_v25  ;;  %574 = vmatpush.bf16.msra.mxu2 (%p79_p0), %v2186_v17  ;;  %v2873_v0 = vld [vmem:[#allocation64_spill] sm:$0xff] (%p79_p0) }
 0x11d   : > { %v1599_v28 = vpop.eup %1598  ;;  %v2162_v15 = vadd.f32 %v350_v27, %v349_v14   ;;  %v2846_v27 = vld [vmem:[#allocation87_spill] sm:$0xff] (%p79_p0)  ;;  %v2256_v14 = vor.u32 (%p79_p0), %v2874_v12, %v2873_v0 }
 0x11e   : > { %v346_v20 = vmul.f32 0.5, %v1599_v28  ;;  %v2182_v28 = vor.u32 (%p79_p0), %v2846_v27, %v2845_v26  ;;  %v2266_v26 = vor.u32 (%p79_p0), %v2878_v24, %v2877_v22  ;;  %v2879_v27 = vld [vmem:[#allocation47_spill] sm:$0xff] (%p79_p0)  ;;  %v2902_v22 = vld [vmem:[#allocation6_spill] sm:$0xff] (%p79_p0) }
 0x11f   : > { %v2839_v19 = vmov %v2162_v15  ;;  %549 = vmatpush.bf16.msra.mxu0 (%p79_p0), %v2196_v31  ;;  %575 = vmatpush.bf16.msra.mxu2 (%p79_p0), %v2209_v38  ;;  %v2272_v13 = vor.u32 (%p79_p0), %v2880_v10, %v2879_v27  ;;  %v2899_v0 = vld [vmem:[#allocation7_spill] sm:$0xff] (%p79_p0) }
 0x120   : > { %1600 = vtanh.f32 %v2839_v19  ;;  %v347_v1 = vadd.f32 0.5, %v346_v20  ;;  %v2841_v15 = vmov %v2839_v19  ;;  %561 = vmatpush.bf16.msra.mxu1 (%p79_p0), %v2182_v28  ;;  %v2875_v20 = vld [vmem:[#allocation45_spill] sm:$0xff] (%p79_p0)  ;;  %v2900_v12 = vld [vmem:[#allocation15_spill] sm:$0xff] (%p79_p0) }
 0x121   :  { %v2872_v15 = vld [vmem:[#allocation65_spill] sm:$0xff] (%p79_p0)  ;;  %v2903_v27 = vld [vmem:[#allocation11_spill] sm:$0xff] (%p79_p0) }
 0x122   :  { %v2252_v18 = vor.u32 (%p79_p0), %v2872_v15, %v2871_v63  ;;  %v2898_v63 = vld [vmem:[#allocation26_spill] sm:$0xff] (%p79_p0)  ;;  %v2904_v10 = vld [vmem:[#allocation19_spill] sm:$0xff] (%p79_p0) }
 0x123   :  { %550 = vmatpush.bf16.msra.mxu0 (%p79_p0), %v2219_v45  ;;  %576 = vmatpush.bf16.msra.mxu2 (%p79_p0), %v2229_v51  ;;  %v2316_v15 = vor.u32 (%p79_p0), %v2898_v63, %v2897_v62 }
 0x124   :  { %562 = vmatpush.bf16.msra.mxu1 (%p79_p0), %v2200_v34 }
 0x126   : > { %v1601_v21 = vpop.eup %1600  ;;  %81 = sbr.rel (!%p79_p0) target bundleno = 107 (0x6b), region = 69 }
 0x127   : > { %v2165_v11 = vmul.f32 %v1601_v21, %v347_v1   ;;  %551 = vmatpush.bf16.msra.mxu0 (%p79_p0), %v2239_v58  ;;  %v2876_v1 = vld [vmem:[#allocation49_spill] sm:$0xff] (%p79_p0)  ;;  %577 = vmatpush.bf16.msra.mxu2 (%p79_p0), %v2252_v18 }
 0x128   :  { %563 = vmatpush.bf16.msra.mxu1 (%p79_p0), %v2223_v48  ;;  %v2262_v21 = vor.u32 (%p79_p0), %v2876_v1, %v2875_v20  ;;  %v2322_v20 = vor.u32 (%p79_p0), %v2900_v12, %v2899_v0  ;;  %v2901_v1 = vld [vmem:[#allocation14_spill] sm:$0xff] (%p79_p0) }
 0x129   : > { %v2840_v23 = vmov %v2165_v11  ;;  %v2326_v24 = vor.u32 (%p79_p0), %v2902_v22, %v2901_v1 }
 0x12a   : > { %v2842_v11 = vmov %v2840_v23  ;;  %v387_v35 = vpack.c.bf16 (%p79_p0), %v2840_v23, %v2840_v23  ;;  %v359_v23 = vpop.permute.xlu0 (%p79_p0), %358 }
 0x12b   :  { %v2849_v11 = vld [vmem:[#allocation97_spill] sm:$0xff]  ;;  %552 = vmatpush.bf16.msra.mxu0 %v2262_v21  ;;  %578 = vmatpush.bf16.msra.mxu2 %v2272_v13  ;;  %v370_v36 = vmul.f32 %v359_v23, %v2130_v5  ;;  %v371_v39 = vmul.f32 %v359_v23, %v2133_v7  ;;  %v372_v54 = vmul.f32 %v359_v23, %v2146_v3 }
 0x12c   :  { %v2190_v4 = vor.u32 %v2850_v2, %v2849_v11  ;;  %564 = vmatpush.bf16.msra.mxu1 %v2243_v61  ;;  %v2881_v11 = vld [vmem:[#allocation50_spill] sm:$0xff]  ;;  %v373_v57 = vmul.f32 %v359_v23, %v2149_v53 }
 0x12d   :  { %v2882_v2 = vld [vmem:[#allocation46_spill] sm:$0xff]  ;;  %v383_v40 = vadd.f32 %v370_v36, %v2138_v8  ;;  %v384_v43 = vadd.f32 %v371_v39, %v2141_v9  ;;  %v385_v0 = vadd.f32 %v372_v54, %v2154_v16 }
 0x12e   :  { %587 = vmatpush.bf16.msra.mxu3 %v2190_v4  ;;  %v2276_v29 = vor.u32 %v2882_v2, %v2881_v11  ;;  %v2332_v11 = vor.u32 %v2904_v10, %v2903_v27  ;;  %v2905_v2 = vld [vmem:[#allocation18_spill] sm:$0xff]  ;;  %v386_v12 = vadd.f32 %v373_v57, %v2157_v6 }
 0x12f   :  { %553 = vmatpush.bf16.msra.mxu0 %v2282_v33  ;;  %579 = vmatpush.bf16.msra.mxu2 %v2292_v42  ;;  %v2336_v32 = vor.u32 %v2906_v30, %v2905_v2 }
 0x130   :  { %565 = vmatpush.bf16.msra.mxu1 %v2266_v26 }
 0x132   :  { %588 = vmatpush.bf16.msra.mxu3 %v2213_v41 }
 0x133   :  { %554 = vmatpush.bf16.msra.mxu0 %v2302_v50  ;;  %580 = vmatpush.bf16.msra.mxu2 %v2312_v60 }
 0x134   :  { %566 = vmatpush.bf16.msra.mxu1 %v2286_v37 }
 0x136   :  { %589 = vmatpush.bf16.msra.mxu3 %v2233_v55 }
 0x137   :  { %555 = vmatpush.bf16.msra.mxu0 %v2322_v20  ;;  %581 = vmatpush.bf16.msra.mxu2 %v2332_v11 }
 0x138   :  { %567 = vmatpush.bf16.msra.mxu1 %v2306_v56 }
 0x13a   :  { %590 = vmatpush.bf16.msra.mxu3 %v2256_v14  ;;  %556 = vmatmul.bf16.vlgmr.msra.gmra.mxu0 %v387_v35 }
 0x13b   :  { %650 = vmatpush.bf16.msrb.mxu0 %v2178_v25  ;;  %582 = vmatmul.bf16.vlgmr.msra.gmra.mxu2 %v387_v35 }
 0x13c   :  { %568 = vmatpush.bf16.msra.mxu1 %v2326_v24  ;;  %676 = vmatpush.bf16.msrb.mxu2 %v2186_v17 }
 0x13e   :  { %591 = vmatpush.bf16.msra.mxu3 %v2276_v29 }
 0x13f   :  { %569 = vmatmul.bf16.vlgmr.msra.gmra.mxu1 %v387_v35  ;;  %651 = vmatpush.bf16.msrb.mxu0 %v2196_v31 }
 0x140   :  { %663 = vmatpush.bf16.msrb.mxu1 %v2182_v28  ;;  %677 = vmatpush.bf16.msrb.mxu2 %v2209_v38 }
 0x142   :  { %592 = vmatpush.bf16.msra.mxu3 %v2296_v46 }
 0x143   :  { %652 = vmatpush.bf16.msrb.mxu0 %v2219_v45 }
 0x144   :  { %664 = vmatpush.bf16.msrb.mxu1 %v2200_v34  ;;  %678 = vmatpush.bf16.msrb.mxu2 %v2229_v51 }
 0x146   :  { %593 = vmatpush.bf16.msra.mxu3 %v2316_v15 }
 0x147   :  { %653 = vmatpush.bf16.msrb.mxu0 %v2239_v58 }
 0x148   :  { %665 = vmatpush.bf16.msrb.mxu1 %v2223_v48  ;;  %679 = vmatpush.bf16.msrb.mxu2 %v2252_v18 }
 0x14a   :  { %594 = vmatpush.bf16.msra.mxu3 %v2336_v32 }
 0x14b   :  { %654 = vmatpush.bf16.msrb.mxu0 %v2262_v21 }
 0x14c   :  { %666 = vmatpush.bf16.msrb.mxu1 %v2243_v61  ;;  %680 = vmatpush.bf16.msrb.mxu2 %v2272_v13 }
 0x14d   :  { %595 = vmatmul.bf16.vlgmr.msra.gmra.mxu3 %v387_v35  ;;  %v1490_v35 = vld [vmem:[%s2690_s0 + $0xd0] sm:$0xff] }
 0x14e   :  { %689 = vmatpush.bf16.msrb.mxu3 %v2190_v4  ;;  %830 = vperm.xlu1 %1603, %v1490_v35   ;;  %v2908_v35 = vld [vmem:[#allocation103_spill] sm:$0xff] }
 0x14f   :  { %655 = vmatpush.bf16.msrb.mxu0 %v2282_v33 }
 0x150   :  { %667 = vmatpush.bf16.msrb.mxu1 %v2266_v26  ;;  %681 = vmatpush.bf16.msrb.mxu2 %v2292_v42 }
 0x152   :  { %690 = vmatpush.bf16.msrb.mxu3 %v2213_v41 }
 0x153   :  { %656 = vmatpush.bf16.msrb.mxu0 %v2302_v50 }
 0x154   :  { %668 = vmatpush.bf16.msrb.mxu1 %v2286_v37  ;;  %682 = vmatpush.bf16.msrb.mxu2 %v2312_v60 }
 0x156   :  { %691 = vmatpush.bf16.msrb.mxu3 %v2233_v55 }
 0x157   :  { %657 = vmatpush.bf16.msrb.mxu0 %v2322_v20 }
 0x158   :  { %669 = vmatpush.bf16.msrb.mxu1 %v2306_v56  ;;  %683 = vmatpush.bf16.msrb.mxu2 %v2332_v11 }
 0x15a   :  { %692 = vmatpush.bf16.msrb.mxu3 %v2256_v14 }
 0x15b   :  { %746 = vmatpush.bf16.msra.mxu0 %v2178_v25 }
 0x15c   :  { %670 = vmatpush.bf16.msrb.mxu1 %v2326_v24  ;;  %772 = vmatpush.bf16.msra.mxu2 %v2186_v17 }
 0x15e   :  { %693 = vmatpush.bf16.msrb.mxu3 %v2276_v29 }
 0x15f   :  { %747 = vmatpush.bf16.msra.mxu0 %v2196_v31 }
 0x160   :  { %759 = vmatpush.bf16.msra.mxu1 %v2182_v28  ;;  %773 = vmatpush.bf16.msra.mxu2 %v2209_v38 }
 0x162   :  { %694 = vmatpush.bf16.msrb.mxu3 %v2296_v46 }
 0x163   :  { %748 = vmatpush.bf16.msra.mxu0 %v2219_v45 }
 0x164   :  { %760 = vmatpush.bf16.msra.mxu1 %v2200_v34  ;;  %774 = vmatpush.bf16.msra.mxu2 %v2229_v51 }
 0x166   :  { %695 = vmatpush.bf16.msrb.mxu3 %v2316_v15 }
 0x167   :  { %749 = vmatpush.bf16.msra.mxu0 %v2239_v58 }
 0x168   :  { %761 = vmatpush.bf16.msra.mxu1 %v2223_v48  ;;  %775 = vmatpush.bf16.msra.mxu2 %v2252_v18 }
 0x16a   :  { %696 = vmatpush.bf16.msrb.mxu3 %v2336_v32 }
 0x16b   :  { %750 = vmatpush.bf16.msra.mxu0 %v2262_v21 }
 0x16c   :  { %762 = vmatpush.bf16.msra.mxu1 %v2243_v61  ;;  %776 = vmatpush.bf16.msra.mxu2 %v2272_v13 }
 0x16e   :  { %785 = vmatpush.bf16.msra.mxu3 %v2190_v4 }
 0x16f   :  { %751 = vmatpush.bf16.msra.mxu0 %v2282_v33 }
 0x170   :  { %763 = vmatpush.bf16.msra.mxu1 %v2266_v26  ;;  %777 = vmatpush.bf16.msra.mxu2 %v2292_v42 }
 0x172   :  { %786 = vmatpush.bf16.msra.mxu3 %v2213_v41 }
 0x173   :  { %752 = vmatpush.bf16.msra.mxu0 %v2302_v50 }
 0x174   :  { %764 = vmatpush.bf16.msra.mxu1 %v2286_v37  ;;  %778 = vmatpush.bf16.msra.mxu2 %v2312_v60 }
 0x176   :  { %787 = vmatpush.bf16.msra.mxu3 %v2233_v55 }
 0x177   :  { %753 = vmatpush.bf16.msra.mxu0 %v2322_v20 }
 0x178   :  { %765 = vmatpush.bf16.msra.mxu1 %v2306_v56  ;;  %779 = vmatpush.bf16.msra.mxu2 %v2332_v11 }
 0x17a   :  { %788 = vmatpush.bf16.msra.mxu3 %v2256_v14 }
 0x17c   :  { %766 = vmatpush.bf16.msra.mxu1 %v2326_v24 }
 0x17e   :  { %789 = vmatpush.bf16.msra.mxu3 %v2276_v29 }
 0x182   :  { %790 = vmatpush.bf16.msra.mxu3 %v2296_v46 }
 0x186   :  { %791 = vmatpush.bf16.msra.mxu3 %v2316_v15 }
 0x18a   :  { %792 = vmatpush.bf16.msra.mxu3 %v2336_v32 }
 0x1b7   :  { %v557_v44 = vpop.f32.mrf.mxu0 }
 0x1b8   :  { %v600_v49 = vadd.f32 %v557_v44, %v383_v40 }
 0x1ba   :  { %v604_v62 = vmul.f32 0.5, %v600_v49 }
 0x1bc   :  { %v570_v47 = vpop.f32.mrf.mxu1  ;;  %1605 = vtanh.f32 %v604_v62 }
 0x1bd   :  { %v601_v52 = vadd.f32 %v570_v47, %v384_v43 }
 0x1be   :  { %v583_v1 = vpop.f32.mrf.mxu2 }
 0x1bf   :  { %v608_v63 = vmul.f32 0.5, %v601_v52  ;;  %v602_v27 = vadd.f32 %v583_v1, %v385_v0  ;;  %v559_v2 = vpop.f32.mrf.mxu0  ;;  %v2907_v1 = vld [vmem:[#allocation102_spill] sm:$0xff] }
 0x1c1   :  { %1607 = vtanh.f32 %v608_v63 }
 0x1c2   :  { %1609 = vtanh.f32 %v602_v27  ;;  %v1606_v36 = vpop.eup %1605 }
 0x1c3   :  { %v606_v40 = vmul.f32 0.5, %v1606_v36 }
 0x1c4   :  { %v572_v30 = vpop.f32.mrf.mxu1 }
 0x1c5   :  { %v607_v44 = vadd.f32 0.5, %v606_v40 }
 0x1c6   :  { %v585_v49 = vpop.f32.mrf.mxu2 }
 0x1c7   :  { %v1608_v39 = vpop.eup %1607 }
 0x1c8   :  { %v610_v43 = vmul.f32 0.5, %v1608_v39  ;;  %v1610_v54 = vpop.eup %1609 }
 0x1c9   :  { %v618_v59 = vmul.f32 %v1610_v54, %v607_v44 }
 0x1ca   :  { %v611_v47 = vadd.f32 0.5, %v610_v43 }
 0x1cc   :  { %v617_v57 = vmul.f32 %v611_v47, %v2839_v19  ;;  %v639_v19 = vpop.permute.xlu0 %638 }
 0x1cd   :  { %v641_v40 = vmul.f32 %v639_v19, %v2130_v5  ;;  %v642_v43 = vmul.f32 %v639_v19, %v2133_v7 }
 0x1ce   :  { %v2423_v63 = vadd.f32 %v618_v59, %v617_v57  ;;  %v643_v59 = vmul.f32 %v639_v19, %v2146_v3 }
 0x1cf   :  { %v645_v44 = vadd.f32 %v641_v40, %v2138_v8  ;;  %v646_v47 = vadd.f32 %v642_v43, %v2141_v9 }
 0x1d0   :  { %v596_v22 = vpop.f32.mrf.mxu3 }
 0x1d1   :  { %v603_v10 = vadd.f32 %v596_v22, %v386_v12  ;;  %v2427_v22 = vperm.slane %v2907_v1, 0 }
 0x1d3   :  { %v612_v23 = vmul.f32 0.5, %v603_v10 }
 0x1d5   :  { %1611 = vtanh.f32 %v612_v23  ;;  %v2463_v23 = vperm.slane %v2908_v35, 0 }
 0x1d6   :  { %1613 = vtanh.f32 %v2423_v63 }
 0x1d8   :  { %v598_v52 = vpop.f32.mrf.mxu3 }
 0x1db   :  { %v1612_v62 = vpop.eup %1611 }
 0x1dc   :  { %v614_v0 = vmul.f32 0.5, %v1612_v62  ;;  %v1614_v27 = vpop.eup %1613  ;;  %v644_v62 = vmul.f32 %v639_v19, %v2149_v53  ;;  %v1494_v19 = vld [vmem:[%s2690_s0 + $0xe0] sm:$0xff] }
 0x1de   :  { %v615_v12 = vadd.f32 0.5, %v614_v0  ;;  %v1492_v0 = vld [vmem:[%s2690_s0 + $0xd8] sm:$0xff] }
 0x1df   :  { %926 = vperm.xlu2 %1604, %v1492_v0  }
 0x1e0   :  { %v621_v10 = vmul.f32 %v1614_v27, %v615_v12  ;;  %v647_v27 = vadd.f32 %v643_v59, %v2154_v16 }
 0x1e2   :  { %v649_v2 = vpack.c.bf16 %v621_v10, %v621_v10  ;;  %v625_v30 = vmul.f32 %v2427_v22, %v621_v10  ;;  %v648_v10 = vadd.f32 %v644_v62, %v2157_v6 }
 0x1e4   :  { %658 = vmatmul.bf16.vlgmr.msrb.gmra.mxu0 %v649_v2  ;;  %671 = vmatmul.bf16.vlgmr.msrb.gmra.mxu1 %v649_v2 }
 0x1e5   :  { %684 = vmatmul.bf16.vlgmr.msrb.gmra.mxu2 %v649_v2  ;;  %697 = vmatmul.bf16.vlgmr.msrb.gmra.mxu3 %v649_v2 }
 0x1e6   :  { %626 = vadd.xlane.f32.xlu0 %v625_v30  ;;  %842 = vmatpush.bf16.msrb.mxu0 %v2178_v25 }
 0x1e7   :  { %855 = vmatpush.bf16.msrb.mxu1 %v2182_v28  ;;  %868 = vmatpush.bf16.msrb.mxu2 %v2186_v17 }
 0x1e8   :  { %881 = vmatpush.bf16.msrb.mxu3 %v2190_v4  ;;  %1022 = vperm.xlu2 %1604, %v1494_v19  }
 0x1ea   :  { %843 = vmatpush.bf16.msrb.mxu0 %v2196_v31 }
 0x1eb   :  { %856 = vmatpush.bf16.msrb.mxu1 %v2200_v34  ;;  %869 = vmatpush.bf16.msrb.mxu2 %v2209_v38 }
 0x1ec   :  { %882 = vmatpush.bf16.msrb.mxu3 %v2213_v41 }
 0x1ee   :  { %844 = vmatpush.bf16.msrb.mxu0 %v2219_v45 }
 0x1ef   :  { %857 = vmatpush.bf16.msrb.mxu1 %v2223_v48  ;;  %870 = vmatpush.bf16.msrb.mxu2 %v2229_v51 }
 0x1f0   :  { %883 = vmatpush.bf16.msrb.mxu3 %v2233_v55 }
 0x1f2   :  { %845 = vmatpush.bf16.msrb.mxu0 %v2239_v58 }
 0x1f3   :  { %858 = vmatpush.bf16.msrb.mxu1 %v2243_v61  ;;  %871 = vmatpush.bf16.msrb.mxu2 %v2252_v18 }
 0x1f4   :  { %884 = vmatpush.bf16.msrb.mxu3 %v2256_v14 }
 0x1f6   :  { %846 = vmatpush.bf16.msrb.mxu0 %v2262_v21 }
 0x1f7   :  { %859 = vmatpush.bf16.msrb.mxu1 %v2266_v26  ;;  %872 = vmatpush.bf16.msrb.mxu2 %v2272_v13 }
 0x1f8   :  { %885 = vmatpush.bf16.msrb.mxu3 %v2276_v29 }
 0x1fa   :  { %847 = vmatpush.bf16.msrb.mxu0 %v2282_v33 }
 0x1fb   :  { %860 = vmatpush.bf16.msrb.mxu1 %v2286_v37  ;;  %873 = vmatpush.bf16.msrb.mxu2 %v2292_v42 }
 0x1fc   :  { %886 = vmatpush.bf16.msrb.mxu3 %v2296_v46 }
 0x1fe   :  { %848 = vmatpush.bf16.msrb.mxu0 %v2302_v50 }
 0x1ff   :  { %861 = vmatpush.bf16.msrb.mxu1 %v2306_v56  ;;  %874 = vmatpush.bf16.msrb.mxu2 %v2312_v60 }
 0x200   :  { %887 = vmatpush.bf16.msrb.mxu3 %v2316_v15 }
 0x202   :  { %849 = vmatpush.bf16.msrb.mxu0 %v2322_v20 }
 0x203   :  { %862 = vmatpush.bf16.msrb.mxu1 %v2326_v24  ;;  %875 = vmatpush.bf16.msrb.mxu2 %v2332_v11 }
 0x204   :  { %888 = vmatpush.bf16.msrb.mxu3 %v2336_v32 }
 0x259   :  { %v627_v36 = vpop.xlane.xlu0 %626 }
 0x25a   :  { %v631_v39 = vadd.f32 %v2463_v23, %v627_v36 }
 0x25c   :  { %633 = vst.msk [vmem:[%s2696_s6] sm:$0xff] %vm632_vm0, %v631_v39 }
 0x261   :  { %v659_v49 = vpop.f32.mrf.mxu0  ;;  %v672_v52 = vpop.f32.mrf.mxu1 }
 0x262   :  { %v702_v54 = vadd.f32 %v659_v49, %v645_v44  ;;  %v703_v57 = vadd.f32 %v672_v52, %v646_v47 }
 0x264   :  { %v706_v12 = vmul.f32 0.5, %v702_v54  ;;  %v710_v1 = vmul.f32 0.5, %v703_v57 }
 0x266   :  { %1615 = vtanh.f32 %v706_v12 }
 0x267   :  { %1617 = vtanh.f32 %v710_v1 }
 0x268   :  { %v685_v2 = vpop.f32.mrf.mxu2  ;;  %v698_v30 = vpop.f32.mrf.mxu3 }
 0x269   :  { %v704_v35 = vadd.f32 %v685_v2, %v647_v27  ;;  %v705_v36 = vadd.f32 %v698_v30, %v648_v10  ;;  %v661_v39 = vpop.f32.mrf.mxu0  ;;  %v674_v40 = vpop.f32.mrf.mxu1 }
 0x26b   :  { %1619 = vtanh.f32 %v704_v35  ;;  %v714_v43 = vmul.f32 0.5, %v705_v36 }
 0x26c   :  { %v1616_v44 = vpop.eup %1615 }
 0x26d   :  { %v1618_v47 = vpop.eup %1617  ;;  %v708_v49 = vmul.f32 0.5, %v1616_v44  ;;  %1621 = vtanh.f32 %v714_v43 }
 0x26e   :  { %v712_v52 = vmul.f32 0.5, %v1618_v47 }
 0x26f   :  { %v709_v54 = vadd.f32 0.5, %v708_v49 }
 0x270   :  { %v713_v57 = vadd.f32 0.5, %v712_v52  ;;  %v687_v59 = vpop.f32.mrf.mxu2  ;;  %v700_v62 = vpop.f32.mrf.mxu3 }
 0x271   :  { %v1620_v0 = vpop.eup %1619 }
 0x272   :  { %v719_v12 = vmul.f32 %v713_v57, %v2423_v63  ;;  %v720_v1 = vmul.f32 %v1620_v0, %v709_v54  ;;  %v735_v63 = vpop.permute.xlu1 %734 }
 0x273   :  { %v1622_v27 = vpop.eup %1621  ;;  %v737_v47 = vmul.f32 %v735_v63, %v2130_v5  ;;  %v738_v49 = vmul.f32 %v735_v63, %v2133_v7 }
 0x274   :  { %v2485_v10 = vadd.f32 %v720_v1, %v719_v12  ;;  %v716_v2 = vmul.f32 0.5, %v1622_v27  ;;  %v739_v12 = vmul.f32 %v735_v63, %v2146_v3  ;;  %v740_v1 = vmul.f32 %v735_v63, %v2149_v53 }
 0x275   :  { %v741_v52 = vadd.f32 %v737_v47, %v2138_v8  ;;  %v742_v54 = vadd.f32 %v738_v49, %v2141_v9 }
 0x276   :  { %1623 = vtanh.f32 %v2485_v10  ;;  %v717_v30 = vadd.f32 0.5, %v716_v2 }
 0x27a   :  { %v2521_v19 = vpop.permute.xlu1 %830 }
 0x27c   :  { %v1624_v35 = vpop.eup %1623 }
 0x27d   :  { %v723_v36 = vmul.f32 %v1624_v35, %v717_v30  ;;  %v743_v30 = vadd.f32 %v739_v12, %v2154_v16  ;;  %v744_v35 = vadd.f32 %v740_v1, %v2157_v6 }
 0x27f   :  { %v745_v39 = vpack.c.bf16 %v723_v36, %v723_v36  ;;  %v724_v40 = vmul.f32 %v723_v36, %v2427_v22 }
 0x281   :  { %754 = vmatmul.bf16.vlgmr.msra.gmra.mxu0 %v745_v39  ;;  %767 = vmatmul.bf16.vlgmr.msra.gmra.mxu1 %v745_v39 }
 0x282   :  { %780 = vmatmul.bf16.vlgmr.msra.gmra.mxu2 %v745_v39  ;;  %793 = vmatmul.bf16.vlgmr.msra.gmra.mxu3 %v745_v39 }
 0x283   :  { %725 = vadd.xlane.f32.xlu1 %v724_v40  ;;  %938 = vmatpush.bf16.msra.mxu0 %v2178_v25 }
 0x284   :  { %951 = vmatpush.bf16.msra.mxu1 %v2182_v28  ;;  %964 = vmatpush.bf16.msra.mxu2 %v2186_v17 }
 0x285   :  { %977 = vmatpush.bf16.msra.mxu3 %v2190_v4 }
 0x287   :  { %939 = vmatpush.bf16.msra.mxu0 %v2196_v31 }
 0x288   :  { %952 = vmatpush.bf16.msra.mxu1 %v2200_v34  ;;  %965 = vmatpush.bf16.msra.mxu2 %v2209_v38 }
 0x289   :  { %978 = vmatpush.bf16.msra.mxu3 %v2213_v41 }
 0x28b   :  { %940 = vmatpush.bf16.msra.mxu0 %v2219_v45 }
 0x28c   :  { %953 = vmatpush.bf16.msra.mxu1 %v2223_v48  ;;  %966 = vmatpush.bf16.msra.mxu2 %v2229_v51 }
 0x28d   :  { %979 = vmatpush.bf16.msra.mxu3 %v2233_v55 }
 0x28f   :  { %941 = vmatpush.bf16.msra.mxu0 %v2239_v58 }
 0x290   :  { %954 = vmatpush.bf16.msra.mxu1 %v2243_v61  ;;  %967 = vmatpush.bf16.msra.mxu2 %v2252_v18 }
 0x291   :  { %980 = vmatpush.bf16.msra.mxu3 %v2256_v14 }
 0x293   :  { %942 = vmatpush.bf16.msra.mxu0 %v2262_v21 }
 0x294   :  { %955 = vmatpush.bf16.msra.mxu1 %v2266_v26  ;;  %968 = vmatpush.bf16.msra.mxu2 %v2272_v13 }
 0x295   :  { %981 = vmatpush.bf16.msra.mxu3 %v2276_v29 }
 0x297   :  { %943 = vmatpush.bf16.msra.mxu0 %v2282_v33 }
 0x298   :  { %956 = vmatpush.bf16.msra.mxu1 %v2286_v37  ;;  %969 = vmatpush.bf16.msra.mxu2 %v2292_v42 }
 0x299   :  { %982 = vmatpush.bf16.msra.mxu3 %v2296_v46 }
 0x29b   :  { %944 = vmatpush.bf16.msra.mxu0 %v2302_v50 }
 0x29c   :  { %957 = vmatpush.bf16.msra.mxu1 %v2306_v56  ;;  %970 = vmatpush.bf16.msra.mxu2 %v2312_v60 }
 0x29d   :  { %983 = vmatpush.bf16.msra.mxu3 %v2316_v15 }
 0x29f   :  { %945 = vmatpush.bf16.msra.mxu0 %v2322_v20 }
 0x2a0   :  { %958 = vmatpush.bf16.msra.mxu1 %v2326_v24  ;;  %971 = vmatpush.bf16.msra.mxu2 %v2332_v11 }
 0x2a1   :  { %984 = vmatpush.bf16.msra.mxu3 %v2336_v32 }
 0x2f6   :  { %v726_v43 = vpop.xlane.xlu1 %725 }
 0x2f7   :  { %v727_v44 = vadd.f32 %v726_v43, %v2463_v23 }
 0x2f9   :  { %1487 = vst.msk [vmem:[%s2696_s6 + $0x8] sm:$0xff] %vm632_vm0, %v727_v44 }
 0x2fe   :  { %v755_v57 = vpop.f32.mrf.mxu0  ;;  %v768_v59 = vpop.f32.mrf.mxu1 }
 0x2ff   :  { %v798_v62 = vadd.f32 %v755_v57, %v741_v52  ;;  %v799_v0 = vadd.f32 %v768_v59, %v742_v54 }
 0x301   :  { %v802_v27 = vmul.f32 0.5, %v798_v62  ;;  %v806_v2 = vmul.f32 0.5, %v799_v0 }
 0x303   :  { %1625 = vtanh.f32 %v802_v27 }
 0x304   :  { %1627 = vtanh.f32 %v806_v2 }
 0x305   :  { %v781_v36 = vpop.f32.mrf.mxu2  ;;  %v794_v39 = vpop.f32.mrf.mxu3 }
 0x306   :  { %v800_v40 = vadd.f32 %v781_v36, %v743_v30  ;;  %v801_v43 = vadd.f32 %v794_v39, %v744_v35  ;;  %v757_v44 = vpop.f32.mrf.mxu0  ;;  %v770_v47 = vpop.f32.mrf.mxu1 }
 0x308   :  { %1629 = vtanh.f32 %v800_v40  ;;  %v810_v49 = vmul.f32 0.5, %v801_v43 }
 0x309   :  { %v1626_v52 = vpop.eup %1625 }
 0x30a   :  { %v1628_v54 = vpop.eup %1627  ;;  %v804_v57 = vmul.f32 0.5, %v1626_v52  ;;  %1631 = vtanh.f32 %v810_v49  ;;  %v833_v52 = vmul.f32 %v2521_v19, %v2130_v5 }
 0x30b   :  { %v808_v63 = vmul.f32 0.5, %v1628_v54  ;;  %v834_v54 = vmul.f32 %v2521_v19, %v2133_v7 }
 0x30c   :  { %v805_v59 = vadd.f32 0.5, %v804_v57  ;;  %v837_v57 = vadd.f32 %v833_v52, %v2138_v8 }
 0x30d   :  { %v809_v62 = vadd.f32 0.5, %v808_v63  ;;  %v783_v0 = vpop.f32.mrf.mxu2  ;;  %v796_v27 = vpop.f32.mrf.mxu3  ;;  %v838_v63 = vadd.f32 %v834_v54, %v2141_v9 }
 0x30e   :  { %v1630_v12 = vpop.eup %1629 }
 0x30f   :  { %v815_v1 = vmul.f32 %v809_v62, %v2485_v10  ;;  %v816_v2 = vmul.f32 %v1630_v12, %v805_v59  ;;  %v835_v12 = vmul.f32 %v2521_v19, %v2146_v3 }
 0x310   :  { %v1632_v6 = vpop.eup %1631 }
 0x311   :  { %v2537_v30 = vadd.f32 %v816_v2, %v815_v1  ;;  %v812_v35 = vmul.f32 0.5, %v1632_v6  ;;  %v2573_v6 = vpop.permute.xlu2 %926  ;;  %v836_v1 = vmul.f32 %v2521_v19, %v2149_v53 }
 0x313   :  { %1633 = vtanh.f32 %v2537_v30  ;;  %v813_v36 = vadd.f32 0.5, %v812_v35 }
 0x319   :  { %v1634_v39 = vpop.eup %1633  ;;  %v2575_v10 = vpop.permute.xlu2 %1022 }
 0x31a   :  { %v819_v40 = vmul.f32 %v1634_v39, %v813_v36  ;;  %2909 = vst [vmem:[#allocation8_spill] sm:$0xff] %v2575_v10  ;;  %v839_v36 = vadd.f32 %v835_v12, %v2154_v16  ;;  %v2910_v39 = vld [vmem:[#allocation106_spill] sm:$0xff] }
 0x31c   :  { %v841_v43 = vpack.c.bf16 %v819_v40, %v819_v40  ;;  %v820_v44 = vmul.f32 %v819_v40, %v2427_v22  ;;  %v840_v40 = vadd.f32 %v836_v1, %v2910_v39 }
 0x31e   :  { %850 = vmatmul.bf16.vlgmr.msrb.gmra.mxu0 %v841_v43  ;;  %863 = vmatmul.bf16.vlgmr.msrb.gmra.mxu1 %v841_v43 }
 0x31f   :  { %876 = vmatmul.bf16.vlgmr.msrb.gmra.mxu2 %v841_v43  ;;  %889 = vmatmul.bf16.vlgmr.msrb.gmra.mxu3 %v841_v43 }
 0x320   :  { %821 = vadd.xlane.f32.xlu2 %v820_v44  ;;  %1034 = vmatpush.bf16.msrb.mxu0 %v2178_v25 }
 0x321   :  { %1047 = vmatpush.bf16.msrb.mxu1 %v2182_v28  ;;  %1060 = vmatpush.bf16.msrb.mxu2 %v2186_v17 }
 0x322   :  { %1073 = vmatpush.bf16.msrb.mxu3 %v2190_v4 }
 0x324   :  { %1035 = vmatpush.bf16.msrb.mxu0 %v2196_v31 }
 0x325   :  { %1048 = vmatpush.bf16.msrb.mxu1 %v2200_v34  ;;  %1061 = vmatpush.bf16.msrb.mxu2 %v2209_v38 }
 0x326   :  { %1074 = vmatpush.bf16.msrb.mxu3 %v2213_v41 }
 0x328   :  { %1036 = vmatpush.bf16.msrb.mxu0 %v2219_v45 }
 0x329   :  { %1049 = vmatpush.bf16.msrb.mxu1 %v2223_v48  ;;  %1062 = vmatpush.bf16.msrb.mxu2 %v2229_v51 }
 0x32a   :  { %1075 = vmatpush.bf16.msrb.mxu3 %v2233_v55 }
 0x32c   :  { %1037 = vmatpush.bf16.msrb.mxu0 %v2239_v58 }
 0x32d   :  { %1050 = vmatpush.bf16.msrb.mxu1 %v2243_v61  ;;  %1063 = vmatpush.bf16.msrb.mxu2 %v2252_v18 }
 0x32e   :  { %1076 = vmatpush.bf16.msrb.mxu3 %v2256_v14 }
 0x330   :  { %1038 = vmatpush.bf16.msrb.mxu0 %v2262_v21 }
 0x331   :  { %1051 = vmatpush.bf16.msrb.mxu1 %v2266_v26  ;;  %1064 = vmatpush.bf16.msrb.mxu2 %v2272_v13 }
 0x332   :  { %1077 = vmatpush.bf16.msrb.mxu3 %v2276_v29 }
 0x334   :  { %1039 = vmatpush.bf16.msrb.mxu0 %v2282_v33 }
 0x335   :  { %1052 = vmatpush.bf16.msrb.mxu1 %v2286_v37  ;;  %1065 = vmatpush.bf16.msrb.mxu2 %v2292_v42 }
 0x336   :  { %1078 = vmatpush.bf16.msrb.mxu3 %v2296_v46 }
 0x338   :  { %1040 = vmatpush.bf16.msrb.mxu0 %v2302_v50 }
 0x339   :  { %1053 = vmatpush.bf16.msrb.mxu1 %v2306_v56  ;;  %1066 = vmatpush.bf16.msrb.mxu2 %v2312_v60 }
 0x33a   :  { %1079 = vmatpush.bf16.msrb.mxu3 %v2316_v15 }
 0x33c   :  { %1041 = vmatpush.bf16.msrb.mxu0 %v2322_v20 }
 0x33d   :  { %1054 = vmatpush.bf16.msrb.mxu1 %v2326_v24  ;;  %1067 = vmatpush.bf16.msrb.mxu2 %v2332_v11 }
 0x33e   :  { %1080 = vmatpush.bf16.msrb.mxu3 %v2336_v32 }
 0x393   :  { %v822_v47 = vpop.xlane.xlu2 %821 }
 0x394   :  { %v823_v49 = vadd.f32 %v822_v47, %v2463_v23 }
 0x396   :  { %1489 = vst.msk [vmem:[%s2696_s6 + $0x10] sm:$0xff] %vm632_vm0, %v823_v49 }
 0x39b   :  { %v851_v59 = vpop.f32.mrf.mxu0  ;;  %v864_v62 = vpop.f32.mrf.mxu1 }
 0x39c   :  { %v894_v0 = vadd.f32 %v851_v59, %v837_v57  ;;  %v895_v27 = vadd.f32 %v864_v62, %v838_v63 }
 0x39e   :  { %v898_v2 = vmul.f32 0.5, %v894_v0  ;;  %v902_v35 = vmul.f32 0.5, %v895_v27 }
 0x3a0   :  { %1635 = vtanh.f32 %v898_v2 }
 0x3a1   :  { %1637 = vtanh.f32 %v902_v35 }
 0x3a2   :  { %v877_v43 = vpop.f32.mrf.mxu2  ;;  %v890_v44 = vpop.f32.mrf.mxu3 }
 0x3a3   :  { %v896_v47 = vadd.f32 %v877_v43, %v839_v36  ;;  %v897_v49 = vadd.f32 %v890_v44, %v840_v40  ;;  %v853_v52 = vpop.f32.mrf.mxu0  ;;  %v866_v54 = vpop.f32.mrf.mxu1 }
 0x3a5   :  { %1639 = vtanh.f32 %v896_v47  ;;  %v906_v57 = vmul.f32 0.5, %v897_v49 }
 0x3a6   :  { %v1636_v63 = vpop.eup %1635 }
 0x3a7   :  { %v1638_v59 = vpop.eup %1637  ;;  %v900_v62 = vmul.f32 0.5, %v1636_v63  ;;  %1641 = vtanh.f32 %v906_v57 }
 0x3a8   :  { %v904_v19 = vmul.f32 0.5, %v1638_v59 }
 0x3a9   :  { %v901_v0 = vadd.f32 0.5, %v900_v62 }
 0x3aa   :  { %v905_v27 = vadd.f32 0.5, %v904_v19  ;;  %v879_v2 = vpop.f32.mrf.mxu2  ;;  %v892_v35 = vpop.f32.mrf.mxu3 }
 0x3ab   :  { %v1640_v12 = vpop.eup %1639 }
 0x3ac   :  { %v911_v1 = vmul.f32 %v905_v27, %v2537_v30  ;;  %v912_v10 = vmul.f32 %v1640_v12, %v901_v0  ;;  %v2912_v12 = vld [vmem:[#allocation8_spill] sm:$0xff] }
 0x3ad   :  { %v1642_v39 = vpop.eup %1641 }
 0x3ae   :  { %v2595_v36 = vadd.f32 %v912_v10, %v911_v1  ;;  %v908_v40 = vmul.f32 0.5, %v1642_v39  ;;  %v1025_v1 = vmul.f32 %v2912_v12, %v2130_v5 }
 0x3b0   :  { %1643 = vtanh.f32 %v2595_v36  ;;  %v909_v43 = vadd.f32 0.5, %v908_v40  ;;  %v1029_v40 = vadd.f32 %v1025_v1, %v2138_v8 }
 0x3b6   :  { %v1644_v44 = vpop.eup %1643 }
 0x3b7   :  { %v915_v47 = vmul.f32 %v1644_v44, %v909_v43 }
 0x3b9   :  { %v937_v49 = vpack.c.bf16 %v915_v47, %v915_v47  ;;  %v916_v52 = vmul.f32 %v915_v47, %v2427_v22 }
 0x3bb   :  { %946 = vmatmul.bf16.vlgmr.msra.gmra.mxu0 %v937_v49  ;;  %959 = vmatmul.bf16.vlgmr.msra.gmra.mxu1 %v937_v49 }
 0x3bc   :  { %972 = vmatmul.bf16.vlgmr.msra.gmra.mxu2 %v937_v49  ;;  %985 = vmatmul.bf16.vlgmr.msra.gmra.mxu3 %v937_v49 }
 0x3bd   :  { %917 = vadd.xlane.f32.xlu2 %v916_v52  ;;  %1130 = vmatpush.bf16.msra.mxu0 %v2178_v25  ;;  %v1496_v25 = vld [vmem:[%s2690_s0 + $0xe8] sm:$0xff] }
 0x3be   :  { %1143 = vmatpush.bf16.msra.mxu1 %v2182_v28  ;;  %1156 = vmatpush.bf16.msra.mxu2 %v2186_v17 }
 0x3bf   :  { %1169 = vmatpush.bf16.msra.mxu3 %v2190_v4  ;;  %v929_v4 = vmul.f32 %v2573_v6, %v2130_v5 }
 0x3c1   :  { %1131 = vmatpush.bf16.msra.mxu0 %v2196_v31  ;;  %v930_v31 = vmul.f32 %v2573_v6, %v2133_v7 }
 0x3c2   :  { %1144 = vmatpush.bf16.msra.mxu1 %v2200_v34  ;;  %1157 = vmatpush.bf16.msra.mxu2 %v2209_v38  ;;  %v933_v34 = vadd.f32 %v929_v4, %v2138_v8 }
 0x3c3   :  { %1170 = vmatpush.bf16.msra.mxu3 %v2213_v41  ;;  %v934_v38 = vadd.f32 %v930_v31, %v2141_v9 }
 0x3c5   :  { %1132 = vmatpush.bf16.msra.mxu0 %v2219_v45 }
 0x3c6   :  { %1145 = vmatpush.bf16.msra.mxu1 %v2223_v48  ;;  %1158 = vmatpush.bf16.msra.mxu2 %v2229_v51 }
 0x3c7   :  { %1171 = vmatpush.bf16.msra.mxu3 %v2233_v55  ;;  %v931_v55 = vmul.f32 %v2573_v6, %v2146_v3 }
 0x3c9   :  { %1133 = vmatpush.bf16.msra.mxu0 %v2239_v58  ;;  %v932_v58 = vmul.f32 %v2573_v6, %v2149_v53 }
 0x3ca   :  { %1146 = vmatpush.bf16.msra.mxu1 %v2243_v61  ;;  %1159 = vmatpush.bf16.msra.mxu2 %v2252_v18 }
 0x3cb   :  { %1172 = vmatpush.bf16.msra.mxu3 %v2256_v14  ;;  %v935_v14 = vadd.f32 %v931_v55, %v2154_v16 }
 0x3cd   :  { %1134 = vmatpush.bf16.msra.mxu0 %v2262_v21  ;;  %v2911_v21 = vld [vmem:[#allocation106_spill] sm:$0xff] }
 0x3ce   :  { %1147 = vmatpush.bf16.msra.mxu1 %v2266_v26  ;;  %1160 = vmatpush.bf16.msra.mxu2 %v2272_v13  ;;  %v936_v26 = vadd.f32 %v932_v58, %v2911_v21 }
 0x3cf   :  { %1173 = vmatpush.bf16.msra.mxu3 %v2276_v29 }
 0x3d1   :  { %1135 = vmatpush.bf16.msra.mxu0 %v2282_v33 }
 0x3d2   :  { %1148 = vmatpush.bf16.msra.mxu1 %v2286_v37  ;;  %1161 = vmatpush.bf16.msra.mxu2 %v2292_v42 }
 0x3d3   :  { %1174 = vmatpush.bf16.msra.mxu3 %v2296_v46 }
 0x3d5   :  { %1118 = vperm.xlu2 %1604, %v1496_v25   ;;  %1136 = vmatpush.bf16.msra.mxu0 %v2302_v50  ;;  %v1027_v25 = vmul.f32 %v2912_v12, %v2146_v3 }
 0x3d6   :  { %1149 = vmatpush.bf16.msra.mxu1 %v2306_v56  ;;  %1162 = vmatpush.bf16.msra.mxu2 %v2312_v60 }
 0x3d7   :  { %1175 = vmatpush.bf16.msra.mxu3 %v2316_v15  ;;  %v1031_v31 = vadd.f32 %v1027_v25, %v2154_v16 }
 0x3d9   :  { %1137 = vmatpush.bf16.msra.mxu0 %v2322_v20 }
 0x3da   :  { %1150 = vmatpush.bf16.msra.mxu1 %v2326_v24  ;;  %1163 = vmatpush.bf16.msra.mxu2 %v2332_v11 }
 0x3db   :  { %1176 = vmatpush.bf16.msra.mxu3 %v2336_v32 }
 0x430   :  { %v918_v28 = vpop.xlane.xlu2 %917 }
 0x431   :  { %v919_v17 = vadd.f32 %v918_v28, %v2463_v23  ;;  %v1028_v28 = vmul.f32 %v2912_v12, %v2149_v53 }
 0x433   :  { %1491 = vst.msk [vmem:[%s2696_s6 + $0x18] sm:$0xff] %vm632_vm0, %v919_v17 }
 0x438   :  { %v947_v41 = vpop.f32.mrf.mxu0  ;;  %v960_v48 = vpop.f32.mrf.mxu1 }
 0x439   :  { %v990_v45 = vadd.f32 %v947_v41, %v933_v34  ;;  %v991_v51 = vadd.f32 %v960_v48, %v934_v38  ;;  %v1032_v34 = vadd.f32 %v1028_v28, %v2911_v21 }
 0x43b   :  { %v994_v61 = vmul.f32 0.5, %v990_v45  ;;  %v998_v18 = vmul.f32 0.5, %v991_v51 }
 0x43d   :  { %1645 = vtanh.f32 %v994_v61 }
 0x43e   :  { %1647 = vtanh.f32 %v998_v18 }
 0x43f   :  { %v973_v13 = vpop.f32.mrf.mxu2  ;;  %v986_v29 = vpop.f32.mrf.mxu3 }
 0x440   :  { %v992_v33 = vadd.f32 %v973_v13, %v935_v14  ;;  %v993_v37 = vadd.f32 %v986_v29, %v936_v26  ;;  %v949_v42 = vpop.f32.mrf.mxu0  ;;  %v962_v46 = vpop.f32.mrf.mxu1 }
 0x442   :  { %1649 = vtanh.f32 %v992_v33  ;;  %v1002_v50 = vmul.f32 0.5, %v993_v37 }
 0x443   :  { %v1646_v56 = vpop.eup %1645 }
 0x444   :  { %v1648_v60 = vpop.eup %1647  ;;  %v996_v15 = vmul.f32 0.5, %v1646_v56  ;;  %1651 = vtanh.f32 %v1002_v50 }
 0x445   :  { %v1000_v20 = vmul.f32 0.5, %v1648_v60 }
 0x446   :  { %v997_v24 = vadd.f32 0.5, %v996_v15 }
 0x447   :  { %v1001_v11 = vadd.f32 0.5, %v1000_v20  ;;  %v975_v32 = vpop.f32.mrf.mxu2  ;;  %v988_v30 = vpop.f32.mrf.mxu3 }
 0x448   :  { %v1650_v6 = vpop.eup %1649 }
 0x449   :  { %v1007_v10 = vmul.f32 %v1001_v11, %v2595_v36  ;;  %v1008_v39 = vmul.f32 %v1650_v6, %v997_v24  ;;  %v1026_v36 = vmul.f32 %v2912_v12, %v2133_v7  ;;  %v1119_v6 = vpop.permute.xlu2 %1118 }
 0x44a   :  { %v1652_v54 = vpop.eup %1651 }
 0x44b   :  { %v1009_v57 = vadd.f32 %v1008_v39, %v1007_v10  ;;  %v1004_v63 = vmul.f32 0.5, %v1652_v54  ;;  %v1030_v43 = vadd.f32 %v1026_v36, %v2141_v9  ;;  %v1121_v54 = vmul.f32 %v1119_v6, %v2130_v5 }
 0x44d   :  { %1653 = vtanh.f32 %v1009_v57  ;;  %v1005_v59 = vadd.f32 0.5, %v1004_v63  ;;  %v1125_v63 = vadd.f32 %v1121_v54, %v2138_v8 }
 0x453   :  { %v1654_v62 = vpop.eup %1653 }
 0x454   :  { %v1011_v19 = vmul.f32 %v1654_v62, %v1005_v59 }
 0x456   :  { %v1033_v0 = vpack.c.bf16 %v1011_v19, %v1011_v19  ;;  %v1012_v27 = vmul.f32 %v1011_v19, %v2427_v22 }
 0x458   :  { %1042 = vmatmul.bf16.vlgmr.msrb.gmra.mxu0 %v1033_v0  ;;  %1055 = vmatmul.bf16.vlgmr.msrb.gmra.mxu1 %v1033_v0 }
 0x459   :  { %1068 = vmatmul.bf16.vlgmr.msrb.gmra.mxu2 %v1033_v0  ;;  %1081 = vmatmul.bf16.vlgmr.msrb.gmra.mxu3 %v1033_v0 }
 0x45a   :  { %1013 = vadd.xlane.f32.xlu0 %v1012_v27 }
 0x4cd   :  { %v1014_v2 = vpop.xlane.xlu0 %1013 }
 0x4ce   :  { %v1015_v35 = vadd.f32 %v1014_v2, %v2463_v23  ;;  %v1123_v2 = vmul.f32 %v1119_v6, %v2146_v3 }
 0x4d0   :  { %1493 = vst.msk [vmem:[%s2696_s6 + $0x20] sm:$0xff] %vm632_vm0, %v1015_v35  ;;  %v1124_v35 = vmul.f32 %v1119_v6, %v2149_v53  ;;  %v1127_v5 = vadd.f32 %v1123_v2, %v2154_v16 }
 0x4d5   :  { %v1043_v44 = vpop.f32.mrf.mxu0  ;;  %v1056_v47 = vpop.f32.mrf.mxu1 }
 0x4d6   :  { %v1086_v49 = vadd.f32 %v1043_v44, %v1029_v40  ;;  %v1087_v52 = vadd.f32 %v1056_v47, %v1030_v43 }
 0x4d8   :  { %v1090_v17 = vmul.f32 0.5, %v1086_v49  ;;  %v1094_v4 = vmul.f32 0.5, %v1087_v52 }
 0x4da   :  { %1655 = vtanh.f32 %v1090_v17 }
 0x4db   :  { %1657 = vtanh.f32 %v1094_v4 }
 0x4dc   :  { %v1069_v38 = vpop.f32.mrf.mxu2  ;;  %v1082_v41 = vpop.f32.mrf.mxu3 }
 0x4dd   :  { %v1088_v45 = vadd.f32 %v1069_v38, %v1031_v31  ;;  %v1089_v48 = vadd.f32 %v1082_v41, %v1032_v34  ;;  %v1045_v51 = vpop.f32.mrf.mxu0  ;;  %v1058_v55 = vpop.f32.mrf.mxu1 }
 0x4df   :  { %1659 = vtanh.f32 %v1088_v45  ;;  %v1098_v58 = vmul.f32 0.5, %v1089_v48 }
 0x4e0   :  { %v1656_v61 = vpop.eup %1655 }
 0x4e1   :  { %v1658_v18 = vpop.eup %1657  ;;  %v1092_v14 = vmul.f32 0.5, %v1656_v61  ;;  %1661 = vtanh.f32 %v1098_v58 }
 0x4e2   :  { %v1096_v26 = vmul.f32 0.5, %v1658_v18 }
 0x4e3   :  { %v1093_v13 = vadd.f32 0.5, %v1092_v14 }
 0x4e4   :  { %v1097_v29 = vadd.f32 0.5, %v1096_v26  ;;  %v1071_v33 = vpop.f32.mrf.mxu2  ;;  %v1084_v37 = vpop.f32.mrf.mxu3 }
 0x4e5   :  { %v1660_v42 = vpop.eup %1659 }
 0x4e6   :  { %v1103_v46 = vmul.f32 %v1097_v29, %v1009_v57  ;;  %v1104_v50 = vmul.f32 %v1660_v42, %v1093_v13  ;;  %v1122_v57 = vmul.f32 %v1119_v6, %v2133_v7  ;;  %v1128_v7 = vadd.f32 %v1124_v35, %v2911_v21 }
 0x4e7   :  { %v1662_v56 = vpop.eup %1661 }
 0x4e8   :  { %v1105_v60 = vadd.f32 %v1104_v50, %v1103_v46  ;;  %v1100_v15 = vmul.f32 0.5, %v1662_v56  ;;  %v1126_v59 = vadd.f32 %v1122_v57, %v2141_v9 }
 0x4ea   :  { %1663 = vtanh.f32 %v1105_v60  ;;  %v1101_v20 = vadd.f32 0.5, %v1100_v15 }
 0x4f0   :  { %v1664_v24 = vpop.eup %1663 }
 0x4f1   :  { %v1107_v11 = vmul.f32 %v1664_v24, %v1101_v20 }
 0x4f3   :  { %v1129_v32 = vpack.c.bf16 %v1107_v11, %v1107_v11  ;;  %v1108_v30 = vmul.f32 %v1107_v11, %v2427_v22 }
 0x4f5   :  { %1138 = vmatmul.bf16.vlgmr.msra.gmra.mxu0 %v1129_v32  ;;  %1151 = vmatmul.bf16.vlgmr.msra.gmra.mxu1 %v1129_v32 }
 0x4f6   :  { %1164 = vmatmul.bf16.vlgmr.msra.gmra.mxu2 %v1129_v32  ;;  %1177 = vmatmul.bf16.vlgmr.msra.gmra.mxu3 %v1129_v32 }
 0x4f7   :  { %1109 = vadd.xlane.f32.xlu1 %v1108_v30 }
 0x56a   :  { %v1110_v10 = vpop.xlane.xlu1 %1109 }
 0x56b   :  { %v1111_v39 = vadd.f32 %v1110_v10, %v2463_v23 }
 0x56d   :  { %1495 = vst.msk [vmem:[%s2696_s6 + $0x28] sm:$0xff] %vm632_vm0, %v1111_v39 }
 0x572   :  { %v1139_v62 = vpop.f32.mrf.mxu0  ;;  %v1152_v19 = vpop.f32.mrf.mxu1 }
 0x573   :  { %v1182_v0 = vadd.f32 %v1139_v62, %v1125_v63  ;;  %v1183_v27 = vadd.f32 %v1152_v19, %v1126_v59 }
 0x575   :  { %v1186_v12 = vmul.f32 0.5, %v1182_v0  ;;  %v1190_v1 = vmul.f32 0.5, %v1183_v27 }
 0x577   :  { %1665 = vtanh.f32 %v1186_v12 }
 0x578   :  { %1667 = vtanh.f32 %v1190_v1 }
 0x579   :  { %v1165_v36 = vpop.f32.mrf.mxu2  ;;  %v1178_v8 = vpop.f32.mrf.mxu3 }
 0x57a   :  { %v1184_v40 = vadd.f32 %v1165_v36, %v1127_v5  ;;  %v1185_v9 = vadd.f32 %v1178_v8, %v1128_v7  ;;  %v1141_v43 = vpop.f32.mrf.mxu0  ;;  %v1154_v44 = vpop.f32.mrf.mxu1 }
 0x57c   :  { %1669 = vtanh.f32 %v1184_v40  ;;  %v1194_v47 = vmul.f32 0.5, %v1185_v9 }
 0x57d   :  { %v1666_v49 = vpop.eup %1665 }
 0x57e   :  { %v1668_v3 = vpop.eup %1667  ;;  %v1188_v52 = vmul.f32 0.5, %v1666_v49  ;;  %1671 = vtanh.f32 %v1194_v47 }
 0x57f   :  { %v1192_v53 = vmul.f32 0.5, %v1668_v3 }
 0x580   :  { %v1189_v25 = vadd.f32 0.5, %v1188_v52 }
 0x581   :  { %v1193_v28 = vadd.f32 0.5, %v1192_v53  ;;  %v1167_v17 = vpop.f32.mrf.mxu2  ;;  %v1180_v4 = vpop.f32.mrf.mxu3 }
 0x582   :  { %v1670_v16 = vpop.eup %1669 }
 0x583   :  { %v1199_v31 = vmul.f32 %v1193_v28, %v1105_v60  ;;  %v1200_v21 = vmul.f32 %v1670_v16, %v1189_v25 }
 0x584   :  { %v1672_v34 = vpop.eup %1671 }
 0x585   :  { %v1201_v38 = vadd.f32 %v1200_v21, %v1199_v31  ;;  %v1196_v41 = vmul.f32 0.5, %v1672_v34 }
 0x587   :  { %1673 = vtanh.f32 %v1201_v38  ;;  %v1197_v45 = vadd.f32 0.5, %v1196_v41 }
 0x58d   :  { %v1674_v48 = vpop.eup %1673 }
 0x58e   :  { %v1203_v51 = vmul.f32 %v1674_v48, %v1197_v45 }
 0x590   :  { %v1204_v55 = vmul.f32 %v1203_v51, %v2427_v22 }
 0x592   :  { %1205 = vadd.xlane.f32.xlu0 %v1204_v55 }
 0x605   :  { %v1206_v58 = vpop.xlane.xlu0 %1205 }
 0x606   :  { %v1207_v61 = vadd.f32 %v1206_v58, %v2463_v23 }
 0x608   :  { %1497 = vst.msk [vmem:[%s2696_s6 + $0x30] sm:$0xff] %vm632_vm0, %v1207_v61 }
 0x609   :  { %1214 = vsyncpa [#allocation4], 1 }

</bundles_post_ra>
